<compile_context>
chip_gen: v7x
topology: tpu7x:2x2x1
jax: 0.10.0
libtpu: 0.0.40
codegen_flags: <defaults>
</compile_context>

<pallas_src>
import functools
import math

import jax
import jax.numpy as jnp
from jax.experimental import pallas as pl
from jax.experimental.pallas import tpu as pltpu


LANE = 128


def _round_up(n, m):
    return -(-n // m) * m


# ----------------------------------------------------------------------------
# Fused stage kernel (one grid step = one (batch, time-tile) pair)
# ----------------------------------------------------------------------------

def _stage_kernel(lens_ref,                                   # scalar prefetch
                  xl_ref, xc_ref, xr_ref,                     # x: halo|centre|halo
                  w_in_ref, b_in_ref,
                  wd_ref, bd_ref, w1_ref, b1_ref,
                  w_out_ref, b_out_ref,
                  out_ref, fin_ref,
                  xpad_ref,
                  *, L, K, T, Tt, halo, guard_l,
                  dilations, pads, cf_pad, cls_pad, kc_pad):
    C = xpad_ref.shape[1]
    wlen = Tt + 2 * halo                       # working rows (centre + halos)
    guard_r = xpad_ref.shape[0] - (guard_l + wlen)

    t = pl.program_id(1)
    length = lens_ref[pl.program_id(0)]
    g0 = t * Tt - halo                         # global frame of working row 0

    # Masks hoisted once per tile (built from global frame indices).
    gi_w = jax.lax.broadcasted_iota(jnp.int32, (wlen, C), 0) + g0
    mask_seq = ((gi_w >= 0) & (gi_w < T)).astype(jnp.float32)        # in [0, T)
    mask_len = ((gi_w >= 0) & (gi_w < length)).astype(jnp.float32)   # valid frames
    gi_c = jax.lax.broadcasted_iota(jnp.int32, (Tt, cls_pad), 0) + t * Tt
    mask_len_c = (gi_c < length).astype(jnp.float32)

    # Zero the guard rows; the layer loop only rewrites the working rows, so
    # the guards provide the dilated conv's zero padding for every layer.
    if guard_l > 0:
        xpad_ref[pl.ds(0, guard_l), :] = jnp.zeros((guard_l, C), jnp.float32)
    if guard_r > 0:
        xpad_ref[pl.ds(guard_l + wlen, guard_r), :] = jnp.zeros(
            (guard_r, C), jnp.float32)

    # Input 1x1 conv over the haloed window (three aligned x pieces).  Frames
    # outside [0, T) must read as zero (the reference zero-pads the activation,
    # not x), hence mask_seq.
    w_in = w_in_ref[...]
    b_in = b_in_ref[...]

    def in_conv(x_piece, row0, nrows):
        v = jnp.dot(x_piece, w_in, preferred_element_type=jnp.float32) + b_in
        xpad_ref[pl.ds(guard_l + row0, nrows), :] = v * mask_seq[row0:row0 + nrows]

    in_conv(xl_ref[0], 0, halo)
    in_conv(xc_ref[0], halo, Tt)
    in_conv(xr_ref[0], halo + Tt, halo)

    lane_zero = None
    if kc_pad > K * C:
        lane_zero = jnp.zeros((wlen, kc_pad - K * C), jnp.float32)

    # Dilated residual layers; the activation stays resident in the working
    # rows of xpad_ref (no separate activation scratch / per-layer copy).
    # TODO(synk): switch to lax.fori_loop with dynamic weight indexing for very
    # large L; at MS-TCN depths static unroll gives the better codegen.
    for l in range(L):
        d = dilations[l]
        p = pads[l]
        base = guard_l - p
        taps = []
        centre = None
        for k in range(K):
            off = base + k * d
            v = xpad_ref[pl.ds(off, wlen), :]
            if off == guard_l:
                centre = v                     # unshifted tap == residual input
            taps.append(v)
        if centre is None:
            centre = xpad_ref[pl.ds(guard_l, wlen), :]
        if lane_zero is not None:
            taps.append(lane_zero)
        # One lane-concatenated LHS -> one deep-contraction MXU dot per layer.
        lhs = jnp.concatenate(taps, axis=1)                      # (wlen, kc_pad)
        y = jnp.dot(lhs, wd_ref[l], preferred_element_type=jnp.float32) + bd_ref[l]
        y = jnp.maximum(y, 0.0)                                  # ReLU
        y = jnp.dot(y, w1_ref[l], preferred_element_type=jnp.float32) + b1_ref[l]
        # TODO(synk): nn.Dropout skipped (inference semantics -> identity).
        xpad_ref[pl.ds(guard_l, wlen), :] = (centre + y) * mask_len

    # Stage outputs (centre rows only), lane-dense: channels padded to 128.
    act_c = xpad_ref[pl.ds(guard_l + halo, Tt), :]               # (Tt, C)
    if cf_pad > C:
        out_val = jnp.concatenate(
            [act_c, jnp.zeros((Tt, cf_pad - C), jnp.float32)], axis=1)
    else:
        out_val = act_c
    out_ref[0] = out_val.astype(out_ref.dtype)

    fin = (jnp.dot(act_c, w_out_ref[...], preferred_element_type=jnp.float32)
           + b_out_ref[...])
    fin_ref[0] = (fin * mask_len_c).astype(fin_ref.dtype)


# ----------------------------------------------------------------------------
# Wrapper
# ----------------------------------------------------------------------------

def single_stage_model(x, lengths, params, kernel_size, *,
                       time_tile=None, vmem_budget_bytes=36 * 2 ** 20,
                       padded_outputs=False):
    """MS-TCN single stage.

    x: (B, T, dim) float32 (time-major, channels last), lengths: (B,) int32.
    Returns (out, final_out) = (B, T, num_f_maps), (B, T, num_classes).
    With padded_outputs=True the channel axes stay padded to 128 and the time
    axis to a multiple of the tile (no HBM slice copy; feed to the next stage).
    """
    B, T, dim = x.shape
    C = params["w_in"].shape[1]
    ncls = params["w_out"].shape[1]
    L = len(params["layers"])
    K = kernel_size
    assert L >= 1

    dilations = tuple(2 ** i for i in range(L))
    pads = tuple(int(d + d * (K - 3) / 2) for d in dilations)
    # Receptive-field halo recomputed per time tile (sublane aligned).
    halo = max(_round_up(sum(pads), 8), 8)
    guard_l = _round_up(max(pads), 8)
    guard_r = max(max((K - 1) * d - p for d, p in zip(dilations, pads)), 0)

    cls_pad = _round_up(ncls, LANE)
    cf_pad = _round_up(C, LANE)
    kc_pad = _round_up(K * C, LANE)

    def est_vmem(tt):
        wl = tt + 2 * halo
        dbl = 2                                   # default double-buffering
        x_blk = dbl * (2 * halo + tt) * dim
        w_blk = dbl * (dim * C + C + L * kc_pad * C + 2 * L * C + L * C * C
                       + C * cls_pad + cls_pad)
        o_blk = dbl * tt * (cf_pad + cls_pad)
        scr = (guard_l + wl + guard_r) * C
        return 4 * (x_blk + w_blk + o_blk + scr)

    if time_tile is None:
        limit_t = _round_up(max(T, 1), halo)
        if B < 2:   # keep >=2 parallel grid steps for v7x's two TensorCores
            limit_t = max(_round_up(-(-T // 2), halo), halo)
        Tt = halo
        while Tt * 2 <= limit_t and est_vmem(Tt * 2) <= vmem_budget_bytes:
            Tt *= 2
    else:
        Tt = max(_round_up(time_tile, halo), halo)

    nT = -(-T // Tt)
    R = Tt // halo

    # Host-side zero pad of x: [Tt zeros | x | zeros], sized so every tile's
    # (left halo | centre | right halo) window maps to whole, aligned blocks.
    Tp = (nT + 1) * Tt + halo
    xp = jnp.pad(x, ((0, 0), (Tt, Tp - Tt - T), (0, 0)))

    # Stacked weights; dilated-conv taps vertically concatenated and zero
    # padded to a 128-deep contraction so each layer is a single MXU dot.
    wd_cat = jnp.stack([
        jnp.pad(lp["wd"].reshape(K * C, C), ((0, kc_pad - K * C), (0, 0)))
        for lp in params["layers"]])                              # (L, kc_pad, C)
    bd = jnp.stack([lp["bd"] for lp in params["layers"]])         # (L, 1, C)
    w1 = jnp.stack([lp["w1"] for lp in params["layers"]])         # (L, C, C)
    b1 = jnp.stack([lp["b1"] for lp in params["layers"]])         # (L, 1, C)
    w_out = jnp.pad(params["w_out"], ((0, 0), (0, cls_pad - ncls)))
    b_out = jnp.pad(params["b_out"], ((0, 0), (0, cls_pad - ncls)))

    kern = functools.partial(
        _stage_kernel, L=L, K=K, T=T, Tt=Tt, halo=halo, guard_l=guard_l,
        dilations=dilations, pads=pads, cf_pad=cf_pad, cls_pad=cls_pad,
        kc_pad=kc_pad)

    # TODO(synk): pipeline_mode=pl.Buffered(1) on the constant-index weight
    # specs once it becomes load-bearing (C >= 128 / large L).
    grid_spec = pltpu.PrefetchScalarGridSpec(
        num_scalar_prefetch=1,
        grid=(B, nT),
        in_specs=[
            pl.BlockSpec((1, halo, dim), lambda b, t, lens: (b, (t + 1) * R - 1, 0)),
            pl.BlockSpec((1, Tt, dim), lambda b, t, lens: (b, t + 1, 0)),
            pl.BlockSpec((1, halo, dim), lambda b, t, lens: (b, (t + 2) * R, 0)),
            pl.BlockSpec((dim, C), lambda b, t, lens: (0, 0)),            # w_in
            pl.BlockSpec((1, C), lambda b, t, lens: (0, 0)),              # b_in
            pl.BlockSpec((L, kc_pad, C), lambda b, t, lens: (0, 0, 0)),   # wd
            pl.BlockSpec((L, 1, C), lambda b, t, lens: (0, 0, 0)),        # bd
            pl.BlockSpec((L, C, C), lambda b, t, lens: (0, 0, 0)),        # w1
            pl.BlockSpec((L, 1, C), lambda b, t, lens: (0, 0, 0)),        # b1
            pl.BlockSpec((C, cls_pad), lambda b, t, lens: (0, 0)),        # w_out
            pl.BlockSpec((1, cls_pad), lambda b, t, lens: (0, 0)),        # b_out
        ],
        out_specs=[
            pl.BlockSpec((1, Tt, cf_pad), lambda b, t, lens: (b, t, 0)),
            pl.BlockSpec((1, Tt, cls_pad), lambda b, t, lens: (b, t, 0)),
        ],
        scratch_shapes=[
            pltpu.VMEM((guard_l + Tt + 2 * halo + guard_r, C), jnp.float32),
        ],
    )

    out_pad, fin_pad = pl.pallas_call(
        kern,
        out_shape=(jax.ShapeDtypeStruct((B, nT * Tt, cf_pad), x.dtype),
                   jax.ShapeDtypeStruct((B, nT * Tt, cls_pad), x.dtype)),
        grid_spec=grid_spec,
        compiler_params=pltpu.CompilerParams(
            dimension_semantics=("parallel", "parallel"),
            vmem_limit_bytes=max(int(est_vmem(Tt) * 1.5) + (2 << 20), 16 << 20)),
    )(lengths.astype(jnp.int32), xp, xp, xp, params["w_in"], params["b_in"],
      wd_cat, bd, w1, b1, w_out, b_out)

    if padded_outputs:
        return out_pad, fin_pad
    # NOTE: this slice materializes an HBM copy; multi-stage consumers should
    # use padded_outputs=True and read the padded slabs directly.
    return out_pad[:, :T, :C], fin_pad[:, :T, :ncls]


# ----------------------------------------------------------------------------
# Deterministic parameter init (PyTorch-default-style uniform(+-1/sqrt(fan_in)))
# ----------------------------------------------------------------------------

def init_params(key, num_layers, num_f_maps, dim, num_classes, kernel_size):
    def uni(k, shape, fan_in):
        bound = 1.0 / math.sqrt(fan_in)
        return jax.random.uniform(k, shape, jnp.float32, -bound, bound)

    keys = jax.random.split(key, 4 + 4 * num_layers)
    params = {
        "w_in": uni(keys[0], (dim, num_f_maps), dim),
        "b_in": uni(keys[1], (1, num_f_maps), dim),
        "w_out": uni(keys[2], (num_f_maps, num_classes), num_f_maps),
        "b_out": uni(keys[3], (1, num_classes), num_f_maps),
        "layers": [],
    }
    for i in range(num_layers):
        kk = keys[4 + 4 * i: 8 + 4 * i]
        fan_d = num_f_maps * kernel_size
        params["layers"].append({
            "wd": uni(kk[0], (kernel_size, num_f_maps, num_f_maps), fan_d),
            "bd": uni(kk[1], (1, num_f_maps), fan_d),
            "w1": uni(kk[2], (num_f_maps, num_f_maps), num_f_maps),
            "b1": uni(kk[3], (1, num_f_maps), num_f_maps),
        })
    return params


# ----------------------------------------------------------------------------
# Pure-JAX reference (verification only)
# ----------------------------------------------------------------------------

def ref_forward(x, mask, params, kernel_size):
    def pconv(a, w, b):
        return jnp.einsum("btc,cd->btd", a, w) + b

    out = pconv(x, params["w_in"], params["b_in"])
    T = x.shape[1]
    for i, lp in enumerate(params["layers"]):
        d = 2 ** i
        pad = int(d + d * (kernel_size - 3) / 2)
        xpad = jnp.pad(out, ((0, 0), (pad, pad), (0, 0)))
        y = sum(jnp.einsum("btc,cd->btd", xpad[:, k * d:k * d + T, :], lp["wd"][k])
                for k in range(kernel_size)) + lp["bd"]
        y = jnp.maximum(y, 0.0)
        y = jnp.einsum("btc,cd->btd", y, lp["w1"]) + lp["b1"]
        out = (out + y) * mask
    final = (pconv(out, params["w_out"], params["b_out"])) * mask
    return out, final


# ----------------------------------------------------------------------------

if __name__ == "__main__":
    # SingleStageModel(num_layers=3, num_f_maps=32, dim=4, num_classes=5,
    # kernel_size=3); PyTorch input (B=2, dim=4, T=16) NCT -> here (B, T, dim).
    B, T = 2, 16
    num_layers, num_f_maps, dim, num_classes, kernel_size = 3, 32, 4, 5, 3

    root = jax.random.PRNGKey(0)
    k_x, k_p = jax.random.split(root)
    x = jax.random.normal(k_x, (B, T, dim), jnp.float32)

    # Per-sequence valid lengths: sample 0 full, sample 1 has 10 valid frames.
    lengths = jnp.array([T, 10], dtype=jnp.int32)
    mask = (jnp.arange(T)[None, :] < lengths[:, None]).astype(jnp.float32)[..., None]

    params = init_params(k_p, num_layers, num_f_maps, dim, num_classes, kernel_size)

    # time_tile=8 forces two time tiles so the halo-recompute path is exercised.
    out, final_out = single_stage_model(x, lengths, params, kernel_size,
                                        time_tile=8)
    out = jax.block_until_ready(out)
    final_out = jax.block_until_ready(final_out)

    ref_out, ref_final = ref_forward(x, mask, params, kernel_size)
    assert out.shape == (B, T, num_f_maps)
    assert final_out.shape == (B, T, num_classes)
    assert jnp.allclose(out, ref_out, atol=1e-4, rtol=1e-4)
    assert jnp.allclose(final_out, ref_final, atol=1e-4, rtol=1e-4)

    print("KERNEL_OK")
</pallas_src>

<mosaic_0001>
module attributes {stable_mosaic.version = 11 : i64} {
  func.func @_stage_kernel(%arg0: i32, %arg1: i32, %arg2: memref<2xi32, #tpu.memory_space<smem>>, %arg3: memref<1x8x4xf32, #tpu.memory_space<vmem>>, %arg4: memref<1x8x4xf32, #tpu.memory_space<vmem>>, %arg5: memref<1x8x4xf32, #tpu.memory_space<vmem>>, %arg6: memref<4x32xf32, #tpu.memory_space<vmem>>, %arg7: memref<1x32xf32, #tpu.memory_space<vmem>>, %arg8: memref<3x128x32xf32, #tpu.memory_space<vmem>>, %arg9: memref<3x1x32xf32, #tpu.memory_space<vmem>>, %arg10: memref<3x32x32xf32, #tpu.memory_space<vmem>>, %arg11: memref<3x1x32xf32, #tpu.memory_space<vmem>>, %arg12: memref<32x128xf32, #tpu.memory_space<vmem>>, %arg13: memref<1x128xf32, #tpu.memory_space<vmem>>, %arg14: memref<1x8x128xf32, #tpu.memory_space<vmem>>, %arg15: memref<1x8x128xf32, #tpu.memory_space<vmem>>, %arg16: memref<36x32xf32, #tpu.memory_space<vmem>>) attributes {dimension_semantics = [#tpu.dimension_semantics<parallel>, #tpu.dimension_semantics<parallel>], iteration_bounds = array<i64: 2, 2>, scalar_prefetch = 1 : i64, scratch_operands = 1 : i64, tpu.core_type = #tpu.core_type<tc>, window_params = [{transform_indices = @transform_0, window_bounds = array<i64: 1, 8, 4>}, {transform_indices = @transform_1, window_bounds = array<i64: 1, 8, 4>}, {transform_indices = @transform_2, window_bounds = array<i64: 1, 8, 4>}, {pipeline_mode = #tpu.pipeline_mode<synchronous>, transform_indices = @transform_3, window_bounds = array<i64: 4, 32>}, {pipeline_mode = #tpu.pipeline_mode<synchronous>, transform_indices = @transform_4, window_bounds = array<i64: 1, 32>}, {pipeline_mode = #tpu.pipeline_mode<synchronous>, transform_indices = @transform_5, window_bounds = array<i64: 3, 128, 32>}, {pipeline_mode = #tpu.pipeline_mode<synchronous>, transform_indices = @transform_6, window_bounds = array<i64: 3, 1, 32>}, {pipeline_mode = #tpu.pipeline_mode<synchronous>, transform_indices = @transform_7, window_bounds = array<i64: 3, 32, 32>}, {pipeline_mode = #tpu.pipeline_mode<synchronous>, transform_indices = @transform_8, window_bounds = array<i64: 3, 1, 32>}, {pipeline_mode = #tpu.pipeline_mode<synchronous>, transform_indices = @transform_9, window_bounds = array<i64: 32, 128>}, {pipeline_mode = #tpu.pipeline_mode<synchronous>, transform_indices = @transform_10, window_bounds = array<i64: 1, 128>}, {transform_indices = @transform_11, window_bounds = array<i64: 1, 8, 128>}, {transform_indices = @transform_12, window_bounds = array<i64: 1, 8, 128>}]} {
    %0 = arith.index_cast %arg0 : i32 to index
    %1 = memref.load %arg2[%0] : memref<2xi32, #tpu.memory_space<smem>>
    %c8_i32 = arith.constant 8 : i32
    %2 = arith.muli %arg1, %c8_i32 : i32
    %c8_i32_0 = arith.constant 8 : i32
    %3 = arith.subi %2, %c8_i32_0 : i32
    %4 = tpu.iota {dimensions = array<i32: 0>} : vector<24x32xi32>
    %5 = vector.broadcast %3 : i32 to vector<24x32xi32>
    %6 = arith.addi %4, %5 : vector<24x32xi32>
    %c0_i32 = arith.constant 0 : i32
    %7 = vector.broadcast %c0_i32 : i32 to vector<24x32xi32>
    %8 = arith.cmpi sge, %6, %7 : vector<24x32xi32>
    %c16_i32 = arith.constant 16 : i32
    %9 = vector.broadcast %c16_i32 : i32 to vector<24x32xi32>
    %10 = arith.cmpi slt, %6, %9 : vector<24x32xi32>
    %11 = arith.andi %8, %10 : vector<24x32xi1>
    %12 = arith.extui %11 : vector<24x32xi1> to vector<24x32xi32>
    %13 = arith.sitofp %12 : vector<24x32xi32> to vector<24x32xf32>
    %c0_i32_1 = arith.constant 0 : i32
    %14 = vector.broadcast %c0_i32_1 : i32 to vector<24x32xi32>
    %15 = arith.cmpi sge, %6, %14 : vector<24x32xi32>
    %16 = vector.broadcast %1 : i32 to vector<24x32xi32>
    %17 = arith.cmpi slt, %6, %16 : vector<24x32xi32>
    %18 = arith.andi %15, %17 : vector<24x32xi1>
    %19 = arith.extui %18 : vector<24x32xi1> to vector<24x32xi32>
    %20 = arith.sitofp %19 : vector<24x32xi32> to vector<24x32xf32>
    %21 = tpu.iota {dimensions = array<i32: 0>} : vector<8x128xi32>
    %c8_i32_2 = arith.constant 8 : i32
    %22 = arith.muli %arg1, %c8_i32_2 : i32
    %23 = vector.broadcast %22 : i32 to vector<8x128xi32>
    %24 = arith.addi %21, %23 : vector<8x128xi32>
    %25 = vector.broadcast %1 : i32 to vector<8x128xi32>
    %26 = arith.cmpi slt, %24, %25 : vector<8x128xi32>
    %27 = arith.extui %26 : vector<8x128xi1> to vector<8x128xi32>
    %28 = arith.sitofp %27 : vector<8x128xi32> to vector<8x128xf32>
    %cst = arith.constant 0.000000e+00 : f32
    %29 = vector.broadcast %cst : f32 to vector<8x32xf32>
    %c0 = arith.constant 0 : index
    %c0_3 = arith.constant 0 : index
    %30 = vector.load %arg16[%c0, %c0_3] : memref<36x32xf32, #tpu.memory_space<vmem>>, vector<8x32xf32>
    tpu.vector_store %arg16[%c0, %c0_3], %29 {strides = array<i32>} : memref<36x32xf32, #tpu.memory_space<vmem>>, vector<8x32xf32>,
    %cst_4 = arith.constant 0.000000e+00 : f32
    %31 = vector.broadcast %cst_4 : f32 to vector<4x32xf32>
    %c32 = arith.constant 32 : index
    %c0_5 = arith.constant 0 : index
    %32 = vector.load %arg16[%c32, %c0_5] : memref<36x32xf32, #tpu.memory_space<vmem>>, vector<4x32xf32>
    tpu.vector_store %arg16[%c32, %c0_5], %31 {strides = array<i32>} : memref<36x32xf32, #tpu.memory_space<vmem>>, vector<4x32xf32>,
    %c0_6 = arith.constant 0 : index
    %c0_7 = arith.constant 0 : index
    %33 = vector.load %arg6[%c0_6, %c0_7] : memref<4x32xf32, #tpu.memory_space<vmem>>, vector<4x32xf32>
    %c0_8 = arith.constant 0 : index
    %c0_9 = arith.constant 0 : index
    %34 = vector.load %arg7[%c0_8, %c0_9] : memref<1x32xf32, #tpu.memory_space<vmem>>, vector<1x32xf32>
    %c0_10 = arith.constant 0 : index
    %c0_11 = arith.constant 0 : index
    %c0_12 = arith.constant 0 : index
    %35 = vector.load %arg3[%c0_10, %c0_11, %c0_12] : memref<1x8x4xf32, #tpu.memory_space<vmem>>, vector<1x8x4xf32>
    %36 = vector.shape_cast %35 : vector<1x8x4xf32> to vector<8x4xf32>
    %cst_13 = arith.constant dense<0.000000e+00> : vector<8x32xf32>
    %37 = tpu.matmul %36, %33, %cst_13 {dimension_numbers = #tpu.dot_dimension_numbers<[1], [0], [0], [1], [0, 0, 1, 1], [], []>} : vector<8x4xf32>, vector<4x32xf32>, vector<8x32xf32> -> vector<8x32xf32>
    %38 = vector.broadcast %34 : vector<1x32xf32> to vector<8x32xf32>
    %39 = arith.addf %37, %38 : vector<8x32xf32>
    %40 = vector.extract_strided_slice %13 {offsets = [0, 0], sizes = [8, 32], strides = [1, 1]} : vector<24x32xf32> to vector<8x32xf32>
    %41 = arith.mulf %39, %40 : vector<8x32xf32>
    %c8 = arith.constant 8 : index
    %c0_14 = arith.constant 0 : index
    %42 = vector.load %arg16[%c8, %c0_14] : memref<36x32xf32, #tpu.memory_space<vmem>>, vector<8x32xf32>
    tpu.vector_store %arg16[%c8, %c0_14], %41 {strides = array<i32>} : memref<36x32xf32, #tpu.memory_space<vmem>>, vector<8x32xf32>,
    %c0_15 = arith.constant 0 : index
    %c0_16 = arith.constant 0 : index
    %c0_17 = arith.constant 0 : index
    %43 = vector.load %arg4[%c0_15, %c0_16, %c0_17] : memref<1x8x4xf32, #tpu.memory_space<vmem>>, vector<1x8x4xf32>
    %44 = vector.shape_cast %43 : vector<1x8x4xf32> to vector<8x4xf32>
    %cst_18 = arith.constant dense<0.000000e+00> : vector<8x32xf32>
    %45 = tpu.matmul %44, %33, %cst_18 {dimension_numbers = #tpu.dot_dimension_numbers<[1], [0], [0], [1], [0, 0, 1, 1], [], []>} : vector<8x4xf32>, vector<4x32xf32>, vector<8x32xf32> -> vector<8x32xf32>
    %46 = vector.broadcast %34 : vector<1x32xf32> to vector<8x32xf32>
    %47 = arith.addf %45, %46 : vector<8x32xf32>
    %48 = vector.extract_strided_slice %13 {offsets = [8, 0], sizes = [8, 32], strides = [1, 1]} : vector<24x32xf32> to vector<8x32xf32>
    %49 = arith.mulf %47, %48 : vector<8x32xf32>
    %c16 = arith.constant 16 : index
    %c0_19 = arith.constant 0 : index
    %50 = vector.load %arg16[%c16, %c0_19] : memref<36x32xf32, #tpu.memory_space<vmem>>, vector<8x32xf32>
    tpu.vector_store %arg16[%c16, %c0_19], %49 {strides = array<i32>} : memref<36x32xf32, #tpu.memory_space<vmem>>, vector<8x32xf32>,
    %c0_20 = arith.constant 0 : index
    %c0_21 = arith.constant 0 : index
    %c0_22 = arith.constant 0 : index
    %51 = vector.load %arg5[%c0_20, %c0_21, %c0_22] : memref<1x8x4xf32, #tpu.memory_space<vmem>>, vector<1x8x4xf32>
    %52 = vector.shape_cast %51 : vector<1x8x4xf32> to vector<8x4xf32>
    %cst_23 = arith.constant dense<0.000000e+00> : vector<8x32xf32>
    %53 = tpu.matmul %52, %33, %cst_23 {dimension_numbers = #tpu.dot_dimension_numbers<[1], [0], [0], [1], [0, 0, 1, 1], [], []>} : vector<8x4xf32>, vector<4x32xf32>, vector<8x32xf32> -> vector<8x32xf32>
    %54 = vector.broadcast %34 : vector<1x32xf32> to vector<8x32xf32>
    %55 = arith.addf %53, %54 : vector<8x32xf32>
    %56 = vector.extract_strided_slice %13 {offsets = [16, 0], sizes = [8, 32], strides = [1, 1]} : vector<24x32xf32> to vector<8x32xf32>
    %57 = arith.mulf %55, %56 : vector<8x32xf32>
    %c24 = arith.constant 24 : index
    %c0_24 = arith.constant 0 : index
    %58 = vector.load %arg16[%c24, %c0_24] : memref<36x32xf32, #tpu.memory_space<vmem>>, vector<8x32xf32>
    tpu.vector_store %arg16[%c24, %c0_24], %57 {strides = array<i32>} : memref<36x32xf32, #tpu.memory_space<vmem>>, vector<8x32xf32>,
    %cst_25 = arith.constant 0.000000e+00 : f32
    %59 = vector.broadcast %cst_25 : f32 to vector<24x32xf32>
    %c7 = arith.constant 7 : index
    %c0_26 = arith.constant 0 : index
    %60 = vector.load %arg16[%c7, %c0_26] : memref<36x32xf32, #tpu.memory_space<vmem>>, vector<24x32xf32>
    %c8_27 = arith.constant 8 : index
    %c0_28 = arith.constant 0 : index
    %61 = vector.load %arg16[%c8_27, %c0_28] : memref<36x32xf32, #tpu.memory_space<vmem>>, vector<24x32xf32>
    %c9 = arith.constant 9 : index
    %c0_29 = arith.constant 0 : index
    %62 = vector.load %arg16[%c9, %c0_29] : memref<36x32xf32, #tpu.memory_space<vmem>>, vector<24x32xf32>
    %63 = tpu.concatenate %60, %61, %62, %59 in 1 : vector<24x32xf32>, vector<24x32xf32>, vector<24x32xf32>, vector<24x32xf32> -> vector<24x128xf32>
    %c0_30 = arith.constant 0 : index
    %c0_31 = arith.constant 0 : index
    %c0_32 = arith.constant 0 : index
    %64 = vector.load %arg8[%c0_30, %c0_31, %c0_32] : memref<3x128x32xf32, #tpu.memory_space<vmem>>, vector<1x128x32xf32>
    %65 = vector.shape_cast %64 : vector<1x128x32xf32> to vector<128x32xf32>
    %cst_33 = arith.constant dense<0.000000e+00> : vector<24x32xf32>
    %66 = tpu.matmul %63, %65, %cst_33 {dimension_numbers = #tpu.dot_dimension_numbers<[1], [0], [0], [1], [0, 0, 1, 1], [], []>} : vector<24x128xf32>, vector<128x32xf32>, vector<24x32xf32> -> vector<24x32xf32>
    %c0_34 = arith.constant 0 : index
    %c0_35 = arith.constant 0 : index
    %c0_36 = arith.constant 0 : index
    %67 = vector.load %arg9[%c0_34, %c0_35, %c0_36] : memref<3x1x32xf32, #tpu.memory_space<vmem>>, vector<1x1x32xf32>
    %68 = vector.shape_cast %67 : vector<1x1x32xf32> to vector<1x32xf32>
    %69 = vector.broadcast %68 : vector<1x32xf32> to vector<24x32xf32>
    %70 = arith.addf %66, %69 : vector<24x32xf32>
    %cst_37 = arith.constant 0.000000e+00 : f32
    %71 = vector.broadcast %cst_37 : f32 to vector<24x32xf32>
    %72 = arith.maximumf %70, %71 : vector<24x32xf32>
    %c0_38 = arith.constant 0 : index
    %c0_39 = arith.constant 0 : index
    %c0_40 = arith.constant 0 : index
    %73 = vector.load %arg10[%c0_38, %c0_39, %c0_40] : memref<3x32x32xf32, #tpu.memory_space<vmem>>, vector<1x32x32xf32>
    %74 = vector.shape_cast %73 : vector<1x32x32xf32> to vector<32x32xf32>
    %cst_41 = arith.constant dense<0.000000e+00> : vector<24x32xf32>
    %75 = tpu.matmul %72, %74, %cst_41 {dimension_numbers = #tpu.dot_dimension_numbers<[1], [0], [0], [1], [0, 0, 1, 1], [], []>} : vector<24x32xf32>, vector<32x32xf32>, vector<24x32xf32> -> vector<24x32xf32>
    %c0_42 = arith.constant 0 : index
    %c0_43 = arith.constant 0 : index
    %c0_44 = arith.constant 0 : index
    %76 = vector.load %arg11[%c0_42, %c0_43, %c0_44] : memref<3x1x32xf32, #tpu.memory_space<vmem>>, vector<1x1x32xf32>
    %77 = vector.shape_cast %76 : vector<1x1x32xf32> to vector<1x32xf32>
    %78 = vector.broadcast %77 : vector<1x32xf32> to vector<24x32xf32>
    %79 = arith.addf %75, %78 : vector<24x32xf32>
    %80 = arith.addf %61, %79 : vector<24x32xf32>
    %81 = arith.mulf %80, %20 : vector<24x32xf32>
    %c8_45 = arith.constant 8 : index
    %c0_46 = arith.constant 0 : index
    %82 = vector.load %arg16[%c8_45, %c0_46] : memref<36x32xf32, #tpu.memory_space<vmem>>, vector<24x32xf32>
    tpu.vector_store %arg16[%c8_45, %c0_46], %81 {strides = array<i32>} : memref<36x32xf32, #tpu.memory_space<vmem>>, vector<24x32xf32>,
    %c6 = arith.constant 6 : index
    %c0_47 = arith.constant 0 : index
    %83 = vector.load %arg16[%c6, %c0_47] : memref<36x32xf32, #tpu.memory_space<vmem>>, vector<24x32xf32>
    %c8_48 = arith.constant 8 : index
    %c0_49 = arith.constant 0 : index
    %84 = vector.load %arg16[%c8_48, %c0_49] : memref<36x32xf32, #tpu.memory_space<vmem>>, vector<24x32xf32>
    %c10 = arith.constant 10 : index
    %c0_50 = arith.constant 0 : index
    %85 = vector.load %arg16[%c10, %c0_50] : memref<36x32xf32, #tpu.memory_space<vmem>>, vector<24x32xf32>
    %86 = tpu.concatenate %83, %84, %85, %59 in 1 : vector<24x32xf32>, vector<24x32xf32>, vector<24x32xf32>, vector<24x32xf32> -> vector<24x128xf32>
    %c1 = arith.constant 1 : index
    %c0_51 = arith.constant 0 : index
    %c0_52 = arith.constant 0 : index
    %87 = vector.load %arg8[%c1, %c0_51, %c0_52] : memref<3x128x32xf32, #tpu.memory_space<vmem>>, vector<1x128x32xf32>
    %88 = vector.shape_cast %87 : vector<1x128x32xf32> to vector<128x32xf32>
    %cst_53 = arith.constant dense<0.000000e+00> : vector<24x32xf32>
    %89 = tpu.matmul %86, %88, %cst_53 {dimension_numbers = #tpu.dot_dimension_numbers<[1], [0], [0], [1], [0, 0, 1, 1], [], []>} : vector<24x128xf32>, vector<128x32xf32>, vector<24x32xf32> -> vector<24x32xf32>
    %c1_54 = arith.constant 1 : index
    %c0_55 = arith.constant 0 : index
    %c0_56 = arith.constant 0 : index
    %90 = vector.load %arg9[%c1_54, %c0_55, %c0_56] : memref<3x1x32xf32, #tpu.memory_space<vmem>>, vector<1x1x32xf32>
    %91 = vector.shape_cast %90 : vector<1x1x32xf32> to vector<1x32xf32>
    %92 = vector.broadcast %91 : vector<1x32xf32> to vector<24x32xf32>
    %93 = arith.addf %89, %92 : vector<24x32xf32>
    %cst_57 = arith.constant 0.000000e+00 : f32
    %94 = vector.broadcast %cst_57 : f32 to vector<24x32xf32>
    %95 = arith.maximumf %93, %94 : vector<24x32xf32>
    %c1_58 = arith.constant 1 : index
    %c0_59 = arith.constant 0 : index
    %c0_60 = arith.constant 0 : index
    %96 = vector.load %arg10[%c1_58, %c0_59, %c0_60] : memref<3x32x32xf32, #tpu.memory_space<vmem>>, vector<1x32x32xf32>
    %97 = vector.shape_cast %96 : vector<1x32x32xf32> to vector<32x32xf32>
    %cst_61 = arith.constant dense<0.000000e+00> : vector<24x32xf32>
    %98 = tpu.matmul %95, %97, %cst_61 {dimension_numbers = #tpu.dot_dimension_numbers<[1], [0], [0], [1], [0, 0, 1, 1], [], []>} : vector<24x32xf32>, vector<32x32xf32>, vector<24x32xf32> -> vector<24x32xf32>
    %c1_62 = arith.constant 1 : index
    %c0_63 = arith.constant 0 : index
    %c0_64 = arith.constant 0 : index
    %99 = vector.load %arg11[%c1_62, %c0_63, %c0_64] : memref<3x1x32xf32, #tpu.memory_space<vmem>>, vector<1x1x32xf32>
    %100 = vector.shape_cast %99 : vector<1x1x32xf32> to vector<1x32xf32>
    %101 = vector.broadcast %100 : vector<1x32xf32> to vector<24x32xf32>
    %102 = arith.addf %98, %101 : vector<24x32xf32>
    %103 = arith.addf %84, %102 : vector<24x32xf32>
    %104 = arith.mulf %103, %20 : vector<24x32xf32>
    %c8_65 = arith.constant 8 : index
    %c0_66 = arith.constant 0 : index
    %105 = vector.load %arg16[%c8_65, %c0_66] : memref<36x32xf32, #tpu.memory_space<vmem>>, vector<24x32xf32>
    tpu.vector_store %arg16[%c8_65, %c0_66], %104 {strides = array<i32>} : memref<36x32xf32, #tpu.memory_space<vmem>>, vector<24x32xf32>,
    %c4 = arith.constant 4 : index
    %c0_67 = arith.constant 0 : index
    %106 = vector.load %arg16[%c4, %c0_67] : memref<36x32xf32, #tpu.memory_space<vmem>>, vector<24x32xf32>
    %c8_68 = arith.constant 8 : index
    %c0_69 = arith.constant 0 : index
    %107 = vector.load %arg16[%c8_68, %c0_69] : memref<36x32xf32, #tpu.memory_space<vmem>>, vector<24x32xf32>
    %c12 = arith.constant 12 : index
    %c0_70 = arith.constant 0 : index
    %108 = vector.load %arg16[%c12, %c0_70] : memref<36x32xf32, #tpu.memory_space<vmem>>, vector<24x32xf32>
    %109 = tpu.concatenate %106, %107, %108, %59 in 1 : vector<24x32xf32>, vector<24x32xf32>, vector<24x32xf32>, vector<24x32xf32> -> vector<24x128xf32>
    %c2 = arith.constant 2 : index
    %c0_71 = arith.constant 0 : index
    %c0_72 = arith.constant 0 : index
    %110 = vector.load %arg8[%c2, %c0_71, %c0_72] : memref<3x128x32xf32, #tpu.memory_space<vmem>>, vector<1x128x32xf32>
    %111 = vector.shape_cast %110 : vector<1x128x32xf32> to vector<128x32xf32>
    %cst_73 = arith.constant dense<0.000000e+00> : vector<24x32xf32>
    %112 = tpu.matmul %109, %111, %cst_73 {dimension_numbers = #tpu.dot_dimension_numbers<[1], [0], [0], [1], [0, 0, 1, 1], [], []>} : vector<24x128xf32>, vector<128x32xf32>, vector<24x32xf32> -> vector<24x32xf32>
    %c2_74 = arith.constant 2 : index
    %c0_75 = arith.constant 0 : index
    %c0_76 = arith.constant 0 : index
    %113 = vector.load %arg9[%c2_74, %c0_75, %c0_76] : memref<3x1x32xf32, #tpu.memory_space<vmem>>, vector<1x1x32xf32>
    %114 = vector.shape_cast %113 : vector<1x1x32xf32> to vector<1x32xf32>
    %115 = vector.broadcast %114 : vector<1x32xf32> to vector<24x32xf32>
    %116 = arith.addf %112, %115 : vector<24x32xf32>
    %cst_77 = arith.constant 0.000000e+00 : f32
    %117 = vector.broadcast %cst_77 : f32 to vector<24x32xf32>
    %118 = arith.maximumf %116, %117 : vector<24x32xf32>
    %c2_78 = arith.constant 2 : index
    %c0_79 = arith.constant 0 : index
    %c0_80 = arith.constant 0 : index
    %119 = vector.load %arg10[%c2_78, %c0_79, %c0_80] : memref<3x32x32xf32, #tpu.memory_space<vmem>>, vector<1x32x32xf32>
    %120 = vector.shape_cast %119 : vector<1x32x32xf32> to vector<32x32xf32>
    %cst_81 = arith.constant dense<0.000000e+00> : vector<24x32xf32>
    %121 = tpu.matmul %118, %120, %cst_81 {dimension_numbers = #tpu.dot_dimension_numbers<[1], [0], [0], [1], [0, 0, 1, 1], [], []>} : vector<24x32xf32>, vector<32x32xf32>, vector<24x32xf32> -> vector<24x32xf32>
    %c2_82 = arith.constant 2 : index
    %c0_83 = arith.constant 0 : index
    %c0_84 = arith.constant 0 : index
    %122 = vector.load %arg11[%c2_82, %c0_83, %c0_84] : memref<3x1x32xf32, #tpu.memory_space<vmem>>, vector<1x1x32xf32>
    %123 = vector.shape_cast %122 : vector<1x1x32xf32> to vector<1x32xf32>
    %124 = vector.broadcast %123 : vector<1x32xf32> to vector<24x32xf32>
    %125 = arith.addf %121, %124 : vector<24x32xf32>
    %126 = arith.addf %107, %125 : vector<24x32xf32>
    %127 = arith.mulf %126, %20 : vector<24x32xf32>
    %c8_85 = arith.constant 8 : index
    %c0_86 = arith.constant 0 : index
    %128 = vector.load %arg16[%c8_85, %c0_86] : memref<36x32xf32, #tpu.memory_space<vmem>>, vector<24x32xf32>
    tpu.vector_store %arg16[%c8_85, %c0_86], %127 {strides = array<i32>} : memref<36x32xf32, #tpu.memory_space<vmem>>, vector<24x32xf32>,
    %c16_87 = arith.constant 16 : index
    %c0_88 = arith.constant 0 : index
    %129 = vector.load %arg16[%c16_87, %c0_88] : memref<36x32xf32, #tpu.memory_space<vmem>>, vector<8x32xf32>
    %cst_89 = arith.constant 0.000000e+00 : f32
    %130 = vector.broadcast %cst_89 : f32 to vector<8x96xf32>
    %131 = tpu.concatenate %129, %130 in 1 : vector<8x32xf32>, vector<8x96xf32> -> vector<8x128xf32>
    %c0_90 = arith.constant 0 : index
    %c0_91 = arith.constant 0 : index
    %c0_92 = arith.constant 0 : index
    %132 = vector.load %arg14[%c0_90, %c0_91, %c0_92] : memref<1x8x128xf32, #tpu.memory_space<vmem>>, vector<1x8x128xf32>
    %133 = vector.shape_cast %132 : vector<1x8x128xf32> to vector<8x128xf32>
    %134 = vector.shape_cast %131 : vector<8x128xf32> to vector<1x8x128xf32>
    tpu.vector_store %arg14[%c0_90, %c0_91, %c0_92], %134 {strides = array<i32>} : memref<1x8x128xf32, #tpu.memory_space<vmem>>, vector<1x8x128xf32>,
    %c0_93 = arith.constant 0 : index
    %c0_94 = arith.constant 0 : index
    %135 = vector.load %arg12[%c0_93, %c0_94] : memref<32x128xf32, #tpu.memory_space<vmem>>, vector<32x128xf32>
    %cst_95 = arith.constant dense<0.000000e+00> : vector<8x128xf32>
    %136 = tpu.matmul %129, %135, %cst_95 {dimension_numbers = #tpu.dot_dimension_numbers<[1], [0], [0], [1], [0, 0, 1, 1], [], []>} : vector<8x32xf32>, vector<32x128xf32>, vector<8x128xf32> -> vector<8x128xf32>
    %c0_96 = arith.constant 0 : index
    %c0_97 = arith.constant 0 : index
    %137 = vector.load %arg13[%c0_96, %c0_97] : memref<1x128xf32, #tpu.memory_space<vmem>>, vector<1x128xf32>
    %138 = vector.broadcast %137 : vector<1x128xf32> to vector<8x128xf32>
    %139 = arith.addf %136, %138 : vector<8x128xf32>
    %140 = arith.mulf %139, %28 : vector<8x128xf32>
    %c0_98 = arith.constant 0 : index
    %c0_99 = arith.constant 0 : index
    %c0_100 = arith.constant 0 : index
    %141 = vector.load %arg15[%c0_98, %c0_99, %c0_100] : memref<1x8x128xf32, #tpu.memory_space<vmem>>, vector<1x8x128xf32>
    %142 = vector.shape_cast %141 : vector<1x8x128xf32> to vector<8x128xf32>
    %143 = vector.shape_cast %140 : vector<8x128xf32> to vector<1x8x128xf32>
    tpu.vector_store %arg15[%c0_98, %c0_99, %c0_100], %143 {strides = array<i32>} : memref<1x8x128xf32, #tpu.memory_space<vmem>>, vector<1x8x128xf32>,
    return
  }
  func.func @transform_0(%arg0: i32, %arg1: i32, %arg2: memref<2xi32, #tpu.memory_space<smem>>) -> (i32, i32, i32) {
    %c1_i32 = arith.constant 1 : i32
    %0 = arith.addi %arg1, %c1_i32 : i32
    %c1_i32_0 = arith.constant 1 : i32
    %1 = arith.muli %0, %c1_i32_0 : i32
    %c1_i32_1 = arith.constant 1 : i32
    %2 = arith.subi %1, %c1_i32_1 : i32
    %c0_i32 = arith.constant 0 : i32
    %c0_i32_2 = arith.constant 0 : i32
    return %arg0, %2, %c0_i32 : i32, i32, i32
  }
  func.func @transform_1(%arg0: i32, %arg1: i32, %arg2: memref<2xi32, #tpu.memory_space<smem>>) -> (i32, i32, i32) {
    %c1_i32 = arith.constant 1 : i32
    %0 = arith.addi %arg1, %c1_i32 : i32
    %c0_i32 = arith.constant 0 : i32
    %c0_i32_0 = arith.constant 0 : i32
    return %arg0, %0, %c0_i32 : i32, i32, i32
  }
  func.func @transform_2(%arg0: i32, %arg1: i32, %arg2: memref<2xi32, #tpu.memory_space<smem>>) -> (i32, i32, i32) {
    %c2_i32 = arith.constant 2 : i32
    %0 = arith.addi %arg1, %c2_i32 : i32
    %c1_i32 = arith.constant 1 : i32
    %1 = arith.muli %0, %c1_i32 : i32
    %c0_i32 = arith.constant 0 : i32
    %c0_i32_0 = arith.constant 0 : i32
    return %arg0, %1, %c0_i32 : i32, i32, i32
  }
  func.func @transform_3(%arg0: i32, %arg1: i32, %arg2: memref<2xi32, #tpu.memory_space<smem>>) -> (i32, i32) {
    %c0_i32 = arith.constant 0 : i32
    %c0_i32_0 = arith.constant 0 : i32
    %c0_i32_1 = arith.constant 0 : i32
    return %c0_i32, %c0_i32_0 : i32, i32
  }
  func.func @transform_4(%arg0: i32, %arg1: i32, %arg2: memref<2xi32, #tpu.memory_space<smem>>) -> (i32, i32) {
    %c0_i32 = arith.constant 0 : i32
    %c0_i32_0 = arith.constant 0 : i32
    %c0_i32_1 = arith.constant 0 : i32
    return %c0_i32, %c0_i32_0 : i32, i32
  }
  func.func @transform_5(%arg0: i32, %arg1: i32, %arg2: memref<2xi32, #tpu.memory_space<smem>>) -> (i32, i32, i32) {
    %c0_i32 = arith.constant 0 : i32
    %c0_i32_0 = arith.constant 0 : i32
    %c0_i32_1 = arith.constant 0 : i32
    %c0_i32_2 = arith.constant 0 : i32
    return %c0_i32, %c0_i32_0, %c0_i32_1 : i32, i32, i32
  }
  func.func @transform_6(%arg0: i32, %arg1: i32, %arg2: memref<2xi32, #tpu.memory_space<smem>>) -> (i32, i32, i32) {
    %c0_i32 = arith.constant 0 : i32
    %c0_i32_0 = arith.constant 0 : i32
    %c0_i32_1 = arith.constant 0 : i32
    %c0_i32_2 = arith.constant 0 : i32
    return %c0_i32, %c0_i32_0, %c0_i32_1 : i32, i32, i32
  }
  func.func @transform_7(%arg0: i32, %arg1: i32, %arg2: memref<2xi32, #tpu.memory_space<smem>>) -> (i32, i32, i32) {
    %c0_i32 = arith.constant 0 : i32
    %c0_i32_0 = arith.constant 0 : i32
    %c0_i32_1 = arith.constant 0 : i32
    %c0_i32_2 = arith.constant 0 : i32
    return %c0_i32, %c0_i32_0, %c0_i32_1 : i32, i32, i32
  }
  func.func @transform_8(%arg0: i32, %arg1: i32, %arg2: memref<2xi32, #tpu.memory_space<smem>>) -> (i32, i32, i32) {
    %c0_i32 = arith.constant 0 : i32
    %c0_i32_0 = arith.constant 0 : i32
    %c0_i32_1 = arith.constant 0 : i32
    %c0_i32_2 = arith.constant 0 : i32
    return %c0_i32, %c0_i32_0, %c0_i32_1 : i32, i32, i32
  }
  func.func @transform_9(%arg0: i32, %arg1: i32, %arg2: memref<2xi32, #tpu.memory_space<smem>>) -> (i32, i32) {
    %c0_i32 = arith.constant 0 : i32
    %c0_i32_0 = arith.constant 0 : i32
    %c0_i32_1 = arith.constant 0 : i32
    return %c0_i32, %c0_i32_0 : i32, i32
  }
  func.func @transform_10(%arg0: i32, %arg1: i32, %arg2: memref<2xi32, #tpu.memory_space<smem>>) -> (i32, i32) {
    %c0_i32 = arith.constant 0 : i32
    %c0_i32_0 = arith.constant 0 : i32
    %c0_i32_1 = arith.constant 0 : i32
    return %c0_i32, %c0_i32_0 : i32, i32
  }
  func.func @transform_11(%arg0: i32, %arg1: i32, %arg2: memref<2xi32, #tpu.memory_space<smem>>) -> (i32, i32, i32) {
    %c0_i32 = arith.constant 0 : i32
    %c0_i32_0 = arith.constant 0 : i32
    return %arg0, %arg1, %c0_i32 : i32, i32, i32
  }
  func.func @transform_12(%arg0: i32, %arg1: i32, %arg2: memref<2xi32, #tpu.memory_space<smem>>) -> (i32, i32, i32) {
    %c0_i32 = arith.constant 0 : i32
    %c0_i32_0 = arith.constant 0 : i32
    return %arg0, %arg1, %c0_i32 : i32, i32, i32
  }
}

</mosaic_0001>

<bundles_post_ra>
// kernel: tpu_custom_call.1
= control target key start
LH: loop header
LB: loop body
LE: loop exit
PB: predicated region body
PF: predicated region fallthrough
CT: control target
= control target key end

     0   :  { %s3335_s0 = inlined_call_operand.vmem [shape: s32[2], index: 0, kind: input, shape index: {}]   ;;  %s3336_s1 = inlined_call_operand.vmem [shape: f32[2,32,4], index: 1, kind: input, shape index: {}]   ;;  %s3337_s2 = inlined_call_operand.vmem [shape: f32[2,32,4], index: 2, kind: input, shape index: {}]   ;;  %s3338_s3 = inlined_call_operand.vmem [shape: f32[2,32,4], index: 3, kind: input, shape index: {}]   ;;  %s3339_s4 = inlined_call_operand.vmem [shape: f32[4,32], index: 4, kind: input, shape index: {}]   ;;  %s3340_s5 = inlined_call_operand.vmem [shape: f32[1,32], index: 5, kind: input, shape index: {}]   ;;  %s3341_s6 = inlined_call_operand.vmem [shape: f32[3,128,32], index: 6, kind: input, shape index: {}]   ;;  %s3342_s7 = inlined_call_operand.vmem [shape: f32[3,1,32], index: 7, kind: input, shape index: {}]   ;;  %s3343_s8 = inlined_call_operand.vmem [shape: f32[3,32,32], index: 8, kind: input, shape index: {}]   ;;  %s3344_s9 = inlined_call_operand.vmem [shape: f32[3,1,32], index: 9, kind: input, shape index: {}]   ;;  %s3345_s10 = inlined_call_operand.vmem [shape: f32[32,128], index: 10, kind: input, shape index: {}]   ;;  %s3346_s11 = inlined_call_operand.vmem [shape: f32[1,128], index: 11, kind: input, shape index: {}]   ;;  %s3347_s12 = inlined_call_operand.hbm [shape: f32[2,16,128], index: 12, kind: output, shape index: {0}]   ;;  %s3348_s13 = inlined_call_operand.hbm [shape: f32[2,16,128], index: 13, kind: output, shape index: {1}]  }
   0x1   :  { %3359 = sst [smem:[#allocation21_spill]] %s3336_s1  ;;  %s19_s27 = sshll.u32 %s3335_s0, 4  ;;  %s20_s27 = int_to_ptr.vmem [resolvable:$true] %s19_s27 }
   0x2   :  { %3360 = sst [smem:[#allocation22_spill]] %s3339_s4  ;;  %s2448_s28 = scalar_lea.vmem %s20_s27, 16 }
   0x3   :  { %p2449_p0 = scmp.ne.s32.totalorder %s20_s27, %s2448_s28  ;;  %p2453_p1 = scmp.lt.s32.totalorder %s20_s27, %s20_s27 }
   0x4   :  { %p2454_p2 = scmp.lt.s32.totalorder %s2448_s28, %s2448_s28 }
   0x6   :  { %p2455_p3 = por %p2454_p2, %p2453_p1 }
   0x8   :  { %p2456_p4 = pnand %p2455_p3, %p2449_p0 }
   0xa   :  { %2459 = shalt.err (!%p2456_p4)  }
   0xb   :  { %s2590_s29 = smov [#allocation4]  }
   0xc   :  { %22 = dma.vmem_to_smem %s20_s27, 16, %s2590_s29, [#allocation3] }
   0xd   :  { %2548 = dma.done.wait [#allocation3], 16 }
   0xe   :  { %2549 = vsyncadd [#allocation3], 4294967280 }
   0xf   :  { %24 = sfence }
  0x10   :  { %25 = vsyncpa [#allocation6], 0 }
  0x11   :  { %27 = vsyncpa [#allocation6 + $0x1], 0 }
  0x12   :  { %28 = vsyncpa [#allocation8], 0 }
  0x13   :  { %30 = vsyncpa [#allocation8 + $0x1], 0  ;;  %s2671_s30 = smov 0   ;;  %s2673_s0 = smov 0  }
  0x14   :  { %s2675_s14 = smov 0   ;;  %s2677_s15 = smov 0  }
  0x15   :  { %s2679_s16 = smov 0   ;;  %s2681_s17 = smov 0  }
  0x16   :  { %s2683_s18 = smov 0   ;;  %s2685_s19 = smov 0  }
  0x17 LB: > { %3361 = sst [smem:[#allocation12_spill]] %s2560_s30  ;;  %s1874_s20 = sadd.s32 4294967295, %s2588_s19   ;;  %s2588_s19 = sphi %s2685_s19, %s36_s19   ;;  %s2584_s18 = sphi %s2683_s18, %s3389_s18   ;;  %s2580_s17 = sphi %s2681_s17, %s3388_s17   ;;  %s2576_s16 = sphi %s2679_s16, %s3387_s16   ;;  %s2572_s15 = sphi %s2677_s15, %s3386_s15   ;;  %s2568_s14 = sphi %s2675_s14, %s3385_s14   ;;  %s2564_s0 = sphi %s2673_s0, %s3391_s0   ;;  %s2560_s30 = sphi %s2671_s30, %s3390_s30  }
  0x18   : > { %3362 = sst [smem:[#allocation13_spill]] %s2568_s14  ;;  %s1875_s21 = sadd.s32 4294967294, %s2588_s19  }
  0x19   : > { %3363 = sst [smem:[#allocation14_spill]] %s2580_s17  ;;  %s45_s22 = sadd.s32 1, %s2580_s17 }
  0x1a   : > { %3364 = sst [smem:[#allocation15_spill]] %s2584_s18  ;;  %p46_p5 = scmp.ge.s32.totalorder %s45_s22, 2 }
  0x1b   : > { %3365 = sst [smem:[#allocation16_spill]] %s2588_s19  ;;  %s48_s23 = sadd.s32 1, %s2584_s18 }
  0x1c   : > { %p323_p6 = scmp.ne.s32.totalorder %s2568_s14, %s2564_s0  ;;  %p324_p7 = scmp.eq.s32.totalorder %s1874_s20, 3 }
  0x1d   : > { %s3393_s22 = smov (%p46_p5, %s45_s22), 0  ;;  %s3395_s23 = smov (!%p46_p5, %s48_s23), %s2584_s18 }
  0x1e   : > { %3366 = sst [smem:[#allocation17_spill]] %s3393_s22  ;;  %s309_s24 = ssub.s32 %s2580_s17, %s3393_s22 }
  0x1f   : > { %p2722_p8 = por %p324_p7, %p323_p6  ;;  %p50_p9 = scmp.ge.s32.totalorder %s3395_s23, 2 }
  0x20   : > { %p329_p10 = scmp.ne.s32.totalorder %s2564_s0, %s2560_s30  ;;  %p330_p11 = scmp.eq.s32.totalorder %s1875_s21, 3 }
  0x21   : > { %p1878_p12 = scmp.ge.s32.totalorder %s2588_s19, 1  ;;  %s3397_s23 = smov (%p50_p9, %s3395_s23), 0 }
  0x22   : > { %3368 = sst [smem:[#allocation18_spill]] %s3397_s23  ;;  %p2731_p13 = por %p330_p11, %p329_p10 }
  0x23   : > { %p437_p0 = scmp.lt.s32.totalorder %s2588_s19, 5  ;;  %s308_s27 = ssub.s32 %s2584_s18, %s3397_s23 }
  0x24   : > { %s3369_s26 = scalar_select %p2731_p13, 1, 0 }
  0x25   : > { %s313_s28 = sadd.s32 1, %s2568_s14  ;;  %s310_s29 = sor.u32 %s309_s24, %s308_s27 }
  0x26   : > { %3370 = sst [smem:[#allocation19_spill]] %s3369_s26  ;;  %p438_p1 = pnand %p1878_p12, %p437_p0 }
  0x27   : > { %p311_p2 = scmp.eq.s32.totalorder %s310_s29, 0  ;;  %s3372_s4 = sld [smem:[#allocation22_spill]] (!%p438_p1)  ;;  %vm594_vm0 = vcmask (!%p438_p1), 1043456   ;;  %v2591_v1 = vmov (!%p438_p1), 0.0   ;;  %vm2592_vm1 = vmmov (!%p438_p1), 0   ;;  %vm577_vm2 = vcmask (!%p438_p1), 261120  }
  0x28   : > { %441 = sbr.rel (%p438_p1) target bundleno = 2200 (0x898), region = 64  ;;  %p505_p3 = scmp.lt.s32.totalorder (!%p438_p1), %s2576_s16, 1  ;;  %2070 = vmatprep.subr.mxu1 (!%p438_p1), %v2591_v1  ;;  %2072 = vmatprep.mubr.msk.f32.mxu1 (!%p438_p1), %vm2592_vm1, %v2591_v1  ;;  %578 = vst.msk [vmem:[#allocation2] sm:$0xff] (!%p438_p1), %vm577_vm2, %v2591_v1  ;;  %vm590_vm3 = vcmask (!%p438_p1), 31744   ;;  %v536_v2 = vlaneseq (!%p438_p1)  ;;  %vm579_vm13 = vcmask (!%p438_p1), 257024   ;;  %v866_v17 = vld [vmem:[%s3341_s6] sm:$0xff] (!%p438_p1) }
  0x29   : > { %s2740_s20 = scalar_select %p311_p2, %s2568_s14, %s313_s28  }
  0x2a   : > { %p507_p4 = scmp.lt.s32.totalorder (!%p438_p1), %s2572_s15, 3  ;;  %s513_s21 = sadd.s32 (!%p438_p1), 1, %s2572_s15  ;;  %2134 = vmatprep.mubr.msk.f32.mxu0 (!%p438_p1), %vm2592_vm1, %v2591_v1  ;;  %v2770_v4 = vshrl.u32 (!%p438_p1), %v536_v2, 7  ;;  %580 = vst.msk [vmem:[#allocation2 + $0x20] sm:$0xf] (!%p438_p1), %vm579_vm13, %v2591_v1  ;;  %v867_v18 = vld [vmem:[%s3341_s6 + $0x8] sm:$0xff] (!%p438_p1) }
  0x2b   : > { %3371 = sst [smem:[#allocation20_spill]] %s2740_s20  ;;  %p516_p5 = scmp.lt.s32.totalorder (!%p438_p1), %s513_s21, 3  ;;  %v868_v19 = vld [vmem:[%s3341_s6 + $0x10] sm:$0xff] (!%p438_p1)  ;;  %v2593_v20 = vmov (!%p438_p1), 0.0|0.0   ;;  %v2271_v21 = vpack.c.bf16 (!%p438_p1), %v867_v18, %v866_v17  ;;  %v869_v22 = vld [vmem:[%s3341_s6 + $0x18] sm:$0xff] (!%p438_p1)  ;;  %v870_v24 = vld [vmem:[%s3341_s6 + $0x20] sm:$0xff] (!%p438_p1) }
  0x2c   : > { %s523_s28 = sadd.s32 (!%p438_p1), 2, %s2572_s15  ;;  %s3373_s1 = sld [smem:[#allocation21_spill]] (!%p438_p1)  ;;  %v538_v11 = vadd.s32 (!%p438_p1), 8, %v2770_v4  ;;  %v539_v13 = vadd.s32 (!%p438_p1), 16, %v2770_v4  ;;  %2294 = vmatprep.subr.bf16.mxu0 (!%p438_p1), %v2593_v20  ;;  %v2274_v23 = vpack.c.bf16 (!%p438_p1), %v869_v22, %v868_v19  ;;  %v871_v25 = vld [vmem:[%s3341_s6 + $0x28] sm:$0xff] (!%p438_p1)  ;;  %v872_v27 = vld [vmem:[%s3341_s6 + $0x30] sm:$0xff] (!%p438_p1) }
  0x2d   : > { %v581_v0 = vld [vmem:[%s3372_s4] sm:$0xf] (!%p438_p1)  ;;  %p526_p6 = scmp.lt.s32.totalorder (!%p438_p1), %s523_s28, 3  ;;  %s533_s20 = sld [smem:[#allocation4 + %s2576_s16]] (!%p438_p1)  ;;  %v2277_v26 = vpack.c.bf16 (!%p438_p1), %v871_v25, %v870_v24  ;;  %v873_v28 = vld [vmem:[%s3341_s6 + $0x38] sm:$0xff] (!%p438_p1)  ;;  %v875_v31 = vld [vmem:[%s3341_s6 + $0x48] sm:$0xff] (!%p438_p1) }
  0x2e   : > { %2071 = vmatpush3.msk.msra.mxu1 (!%p438_p1), %vm594_vm0, %v581_v0  ;;  %v2280_v29 = vpack.c.bf16 (!%p438_p1), %v873_v28, %v872_v27  ;;  %v874_v30 = vld [vmem:[%s3341_s6 + $0x40] sm:$0xff] (!%p438_p1)  ;;  %v876_v33 = vld [vmem:[%s3341_s6 + $0x50] sm:$0xff] (!%p438_p1)  ;;  %v877_v34 = vld [vmem:[%s3341_s6 + $0x58] sm:$0xff] (!%p438_p1)  ;;  %s2594_s26 = smov (!%p438_p1), 32  }
  0x2f   : > { %s506_s17 = scalar_select %p505_p3, %s2576_s16, 1  ;;  %2075 = vmatprep.subr.mxu1 %v2591_v1  ;;  %v2283_v32 = vpack.c.bf16 %v875_v31, %v874_v30  ;;  %v2286_v35 = vpack.c.bf16 %v877_v34, %v876_v33  ;;  %v878_v36 = vld [vmem:[%s3341_s6 + $0x60] sm:$0xff]  ;;  %v879_v37 = vld [vmem:[%s3341_s6 + $0x68] sm:$0xff]  ;;  %v880_v42 = vld [vmem:[%s3341_s6 + $0x70] sm:$0xff] }
  0x30   : > { %s508_s22 = scalar_select %p507_p4, %s2572_s15, 3  ;;  %v2289_v38 = vpack.c.bf16 %v879_v37, %v878_v36  ;;  %v1896_v39 = vld [vmem:[%s3340_s5] ss:$0 sm:$0xff]  ;;  %v881_v43 = vld [vmem:[%s3341_s6 + $0x78] sm:$0xff]  ;;  %v973_v60 = vld [vmem:[%s3343_s8 + $0x8] sm:$0xff] }
  0x31   : > { %s1881_s24 = sshll.u32 %s506_s17, 2  ;;  %s3399_s21 = smov (!%p516_p5, %s513_s21), 3  ;;  %v2292_v46 = vpack.c.bf16 %v881_v43, %v880_v42  ;;  %v972_v59 = vld [vmem:[%s3343_s8] sm:$0xff]  ;;  %v974_v25 = vld [vmem:[%s3343_s8 + $0x10] sm:$0xff]  ;;  %v1912_v42 = vld [vmem:[%s3341_s6 + $0x88] sm:$0xff] }
  0x32   : > { %s510_s27 = sadd.s32 %s1881_s24, %s508_s22  ;;  %s3401_s28 = smov (!%p526_p6, %s523_s28), 3  ;;  %v2295_v61 = vpack.c.bf16 %v973_v60, %v972_v59  ;;  %v1903_v28 = vld [vmem:[%s3342_s7] ss:$0 sm:$0xff]  ;;  %v1913_v43 = vld [vmem:[%s3341_s6 + $0x90] sm:$0xff]  ;;  %v1933_v16 = vld [vmem:[%s3343_s8 + $0x28] sm:$0xff] }
  0x33   : > { %s1882_s29 = sshll.u32 %s510_s27, 3  ;;  %s519_s17 = sadd.s32 %s1881_s24, %s3399_s21  ;;  %v2781_v7 = vstv %s533_s20  ;;  %v1923_v60 = vld [vmem:[%s3341_s6 + $0xe0] sm:$0xff] }
  0x34   : > { %s512_s18 = scalar_lea.vmem %s3373_s1, %s1882_s29  ;;  %s1887_s22 = sshll.u32 %s2572_s15, 3  ;;  %2296 = vmatpush3.bf16.msra.mxu0 %v2295_v61  ;;  %v1924_v61 = vld [vmem:[%s3341_s6 + $0xe8] sm:$0xff] }
  0x35   : > { %v583_v3 = vld [vmem:[%s512_s18] sm:$0xff]  ;;  %s1884_s27 = sshll.u32 %s519_s17, 3  ;;  %s529_s4 = sadd.s32 %s1881_s24, %s3401_s28  ;;  %2297 = vmatprep.subr.bf16.mxu0 %v2593_v20 }
  0x36   : > { %2073 = vmatmul.mubr.msk.f32.vlgmr.msra.gmra.mrb[0].mxu1 %vm590_vm3, %v583_v3  ;;  %s521_s29 = scalar_lea.vmem %s3337_s2, %s1884_s27  ;;  %s1886_s1 = sshll.u32 %s529_s4, 3 }
  0x37   : > { %2076 = vmatpush3.msk.msra.mxu1 %vm594_vm0, %v581_v0  ;;  %2077 = vmatprep.mubr.msk.f32.mxu1 %vm2592_vm1, %v2591_v1  ;;  %v670_v5 = vld [vmem:[%s521_s29] sm:$0xff]  ;;  %s531_s30 = scalar_lea.vmem %s3338_s3, %s1886_s1  ;;  %s1888_s19 = sadd.s32 4294967288, %s1887_s22 }
  0x38   : > { %2080 = vmatprep.subr.mxu1 %v2591_v1  ;;  %v540_v6 = vstv %s1888_s19  ;;  %v746_v8 = vld [vmem:[%s531_s30] sm:$0xff]  ;;  %s2595_s17 = smov 64   ;;  %s3228_s24 = sand.u32 1, %s2564_s0  }
  0x39   : > { %v541_v9 = vadd.s32 %v540_v6, %v2770_v4  ;;  %v542_v12 = vadd.s32 %v540_v6, %v538_v11  ;;  %v2804_v15 = vadd.s32 %v540_v6, %v539_v13  ;;  %s1879_s28 = sshll.u32 %s3228_s24, 3  ;;  %s1691_s30 = scalar_lea.sflag [#allocation6], %s3228_s24 }
  0x3a   : > { %2078 = vmatmul.mubr.msk.f32.vlgmr.msra.gmra.mrb[2].mxu1 %vm590_vm3, %v670_v5  ;;  %s497_s27 = scalar_lea.vmem [#allocation5], %s1879_s28 }
  0x3b   : > { %2081 = vmatpush3.msk.msra.mxu1 %vm594_vm0, %v581_v0  ;;  %2082 = vmatprep.mubr.msk.f32.mxu1 %vm2592_vm1, %v2591_v1  ;;  %vm560_vm4 = vcmp.lt.s32.totalorder %v541_v9, %v2781_v7  ;;  %vm544_vm5 = vcmp.ge.s32.totalorder %v541_v9, 0  ;;  %vm561_vm7 = vcmp.lt.s32.totalorder %v542_v12, %v2781_v7  ;;  %vm545_vm8 = vcmp.ge.s32.totalorder %v542_v12, 0  ;;  %s1711_s4 = sshll.u32 %s497_s27, 4  ;;  %s3242_s4 = int_to_ptr.vmem [resolvable:$true] %s1711_s4 }
  0x3c   : > { %vm2790_vm6 = vmand %vm544_vm5, %vm560_vm4  ;;  %vm546_vm10 = vcmp.ge.s32.totalorder %v2804_v15, 0  ;;  %vm562_vm11 = vcmp.lt.s32.totalorder %v2804_v15, %v2781_v7  ;;  %2270 = vmatprep.subr.bf16.mxu1 %v2593_v20  ;;  %vm547_vm14 = vcmp.lt.s32.totalorder %v541_v9, 16  ;;  %vm548_vm0 = vcmp.lt.s32.totalorder %v542_v12, 16  ;;  %s2460_s14 = scalar_lea.vmem %s3242_s4, 128 }
  0x3d   : > { %vm2800_vm9 = vmand %vm545_vm8, %vm561_vm7  ;;  %vm549_vm4 = vcmp.lt.s32.totalorder %v2804_v15, 16  ;;  %vm858_vm7 = vcmask 523264   ;;  %p2461_p7 = scmp.ne.s32.totalorder %s3242_s4, %s2460_s14 }
  0x3e   : > { %2083 = vmatmul.mubr.msk.f32.vlgmr.msra.gmra.mrb[4].mxu1 %vm590_vm3, %v746_v8  ;;  %vm2811_vm12 = vmand %vm546_vm10, %vm562_vm11  ;;  %v3012_v10 = vsel %vm2800_vm9, 1.0, %v2591_v1 }
  0x3f   : > { %2117 = vmatprep.mubr.msk.f32.mxu1 %vm2592_vm1, %v2591_v1  ;;  %2272 = vmatpush3.bf16.msra.mxu1 %v2271_v21  ;;  %vm550_vm15 = vmand %vm544_vm5, %vm547_vm14  ;;  %p2462_p9 = pnand %p2461_p7, %p2722_p8 }
  0x40   : > { %2273 = vmatprep.subr.bf16.mxu1 %v2593_v20  ;;  %v1889_v40 = vsel %vm550_vm15, 1.0, %v2591_v1  ;;  %vm551_vm3 = vmand %vm545_vm8, %vm548_vm0  ;;  %vm862_vm8 = vcmask 785408  }
  0x41   : > { %v1890_v48 = vsel %vm551_vm3, 1.0, %v2591_v1  ;;  %vm552_vm5 = vmand %vm546_vm10, %vm549_vm4  ;;  %p2463_p10 = pneg %p2462_p9 }
  0x42   : > { %v1891_v53 = vsel %vm552_vm5, 1.0, %v2591_v1 }
  0x43   : > { %2275 = vmatpush3.bf16.msra.mxu1 %v2274_v23 }
  0x44   : > { %2276 = vmatprep.subr.bf16.mxu1 %v2593_v20 }
  0x47   : > { %2278 = vmatpush3.bf16.msra.mxu1 %v2277_v26  ;;  %v975_v26 = vld [vmem:[%s3343_s8 + $0x18] sm:$0xff] }
  0x48   : > { %2279 = vmatprep.subr.bf16.mxu1 %v2593_v20  ;;  %v2298_v27 = vpack.c.bf16 %v975_v26, %v974_v25  ;;  %v3021_v25 = vsel %vm2811_vm12, 1.0, %v2591_v1 }
  0x4a   : > { %2299 = vmatpush3.bf16.msra.mxu0 %v2298_v27 }
  0x4b   : > { %2281 = vmatpush3.bf16.msra.mxu1 %v2280_v29  ;;  %2300 = vmatprep.subr.bf16.mxu0 %v2593_v20 }
  0x4c   : > { %2282 = vmatprep.subr.bf16.mxu1 %v2593_v20 }
  0x4f   : > { %2284 = vmatpush3.bf16.msra.mxu1 %v2283_v32 }
  0x50   : > { %2285 = vmatprep.subr.bf16.mxu1 %v2593_v20 }
  0x53   : > { %2287 = vmatpush3.bf16.msra.mxu1 %v2286_v35 }
  0x54   : > { %2288 = vmatprep.subr.bf16.mxu1 %v2593_v20 }
  0x57   : > { %2290 = vmatpush3.bf16.msra.mxu1 %v2289_v38 }
  0x58   : > { %2291 = vmatprep.subr.bf16.mxu1 %v2593_v20 }
  0x5b   : > { %2293 = vmatpush3.bf16.msra.mxu1 %v2292_v46 }
  0x5c   : > { %2324 = vmatprep.subr.bf16.mxu1 %v2593_v20 }
 0x109   : > { %v664_v41 = vpop.f32.mrb[0].mxu1 }
 0x10a   : > { %v665_v44 = vadd.f32 %v1896_v39, %v664_v41  ;;  %v2074_v45 = vpop.f32.mrb[1].mxu1  ;;  %v1911_v41 = vld [vmem:[%s3341_s6 + $0x80] sm:$0xff] }
 0x10b   : > { %v1914_v45 = vld [vmem:[%s3341_s6 + $0x98] sm:$0xff] }
 0x10c   : > { %v668_v47 = vmul.f32 %v1889_v40, %v665_v44  ;;  %v2301_v44 = vpack.c.bf16 %v1912_v42, %v1911_v41  ;;  %v2304_v46 = vpack.c.bf16 %v1914_v45, %v1913_v43 }
 0x10d   : > { %v740_v49 = vpop.f32.mrb[2].mxu1 }
 0x10e   : > { %669 = vst.msk [vmem:[#allocation2 + $0x8] sm:$0xff] %vm577_vm2, %v668_v47  ;;  %v741_v50 = vadd.f32 %v1896_v39, %v740_v49  ;;  %v2079_v51 = vpop.f32.mrb[3].mxu1  ;;  %v1915_v47 = vld [vmem:[%s3341_s6 + $0xa0] sm:$0xff] }
 0x10f   : > { %v1918_v51 = vld [vmem:[%s3341_s6 + $0xb8] sm:$0xff] }
 0x110   : > { %v744_v52 = vmul.f32 %v1890_v48, %v741_v50  ;;  %v1916_v48 = vld [vmem:[%s3341_s6 + $0xa8] sm:$0xff]  ;;  %v1917_v50 = vld [vmem:[%s3341_s6 + $0xb0] sm:$0xff] }
 0x111   : > { %v816_v54 = vpop.f32.mrb[4].mxu1  ;;  %v2307_v49 = vpack.c.bf16 %v1916_v48, %v1915_v47 }
 0x112   : > { %745 = vst.msk [vmem:[#allocation2 + $0x10] sm:$0xff] %vm577_vm2, %v744_v52  ;;  %v817_v55 = vadd.f32 %v1896_v39, %v816_v54  ;;  %v2084_v56 = vpop.f32.mrb[5].mxu1  ;;  %v2310_v52 = vpack.c.bf16 %v1918_v51, %v1917_v50  ;;  %v1920_v54 = vld [vmem:[%s3341_s6 + $0xc8] sm:$0xff]  ;;  %v1928_v51 = vld [vmem:[%s3342_s7 + $0x1] ss:$0 sm:$0xff] }
 0x113   : > { %v1921_v56 = vld [vmem:[%s3341_s6 + $0xd0] sm:$0xff] }
 0x114   : > { %v820_v57 = vmul.f32 %v1891_v53, %v817_v55  ;;  %v1919_v53 = vld [vmem:[%s3341_s6 + $0xc0] sm:$0xff] }
 0x115   : > { %v2887_v58 = vld [vmem:[#allocation2 + $0x8] sm:$0xff]  ;;  %v2313_v55 = vpack.c.bf16 %v1920_v54, %v1919_v53 }
 0x116   : > { %834 = vrot.lane.b32.xlu0 %v2887_v58, %s2594_s26  ;;  %821 = vst.msk [vmem:[#allocation2 + $0x18] sm:$0xff] %vm577_vm2, %v820_v57  ;;  %v822_v6 = vld [vmem:[#allocation2 + $0x7] sm:$0xff]  ;;  %v1922_v57 = vld [vmem:[%s3341_s6 + $0xd8] sm:$0xff] }
 0x117   : > { %v2316_v59 = vpack.c.bf16 %v1922_v57, %v1921_v56 }
 0x119   : > { %v828_v62 = vld [vmem:[#allocation2 + $0x9] sm:$0xff] }
 0x11a   : > { %v2898_v63 = vld [vmem:[#allocation2 + $0x10] sm:$0xff]  ;;  %846 = vrot.lane.b32.xlu0 %v828_v62, %s2595_s17  ;;  %v2319_v62 = vpack.c.bf16 %v1924_v61, %v1923_v60 }
 0x11b   : > { %836 = vrot.lane.b32.xlu1 %v2898_v63, %s2594_s26  ;;  %v823_v13 = vld [vmem:[#allocation2 + $0xf] sm:$0xff] }
 0x11d   : > { %v829_v0 = vld [vmem:[#allocation2 + $0x11] sm:$0xff]  ;;  %v830_v3 = vld [vmem:[#allocation2 + $0x19] sm:$0xff] }
 0x11e   : > { %v2904_v2 = vld [vmem:[#allocation2 + $0x18] sm:$0xff] }
 0x11f   : > { %848 = vrot.lane.b32.xlu1 %v829_v0, %s2595_s17  ;;  %838 = vrot.lane.b32.xlu0 %v2904_v2, %s2594_s26  ;;  %v824_v21 = vld [vmem:[#allocation2 + $0x17] sm:$0xff]  ;;  %v1907_v0 = vld [vmem:[%s3344_s9] ss:$0 sm:$0xff] }
 0x123   : > { %850 = vrot.lane.b32.xlu1 %v830_v3, %s2595_s17 }
 0x188   : > { %v835_v5 = vpop.permute.xlu0 %834 }
 0x189   : > { %v855_v8 = vsel %vm577_vm2, %v822_v6, %v835_v5 }
 0x18c   : > { %v847_v9 = vpop.permute.xlu0 %846 }
 0x18d   : > { %v837_v11 = vpop.permute.xlu1 %836  ;;  %v859_v12 = vsel %vm858_vm7, %v855_v8, %v847_v9  ;;  %v2999_v8 = vsel %vm2790_vm6, 1.0, %v2591_v1  ;;  %v1925_v9 = vld [vmem:[%s3341_s6 + $0xf0] sm:$0xff] }
 0x18e   : > { %2118 = vmatmul.mubr.msk.f32.vlgmr.msra.gmra.mrb[6].mxu1 %vm862_vm8, %v859_v12  ;;  %v856_v15 = vsel %vm577_vm2, %v823_v13, %v837_v11  ;;  %v1926_v11 = vld [vmem:[%s3341_s6 + $0xf8] sm:$0xff] }
 0x18f   : > { %2120 = vmatprep.mubr.msk.f32.mxu1 %vm2592_vm1, %v2591_v1  ;;  %v2322_v13 = vpack.c.bf16 %v1926_v11, %v1925_v9  ;;  %v1943_v9 = vld [vmem:[%s3341_s6 + $0x110] sm:$0xff] }
 0x191   : > { %v849_v17 = vpop.permute.xlu1 %848  ;;  %v839_v19 = vpop.permute.xlu0 %838 }
 0x192   : > { %v860_v18 = vsel %vm858_vm7, %v856_v15, %v849_v17  ;;  %v857_v22 = vsel %vm577_vm2, %v824_v21, %v839_v19 }
 0x193   : > { %2121 = vmatmul.mubr.msk.f32.gmra.mrb[8].mxu1 %vm862_vm8, %v860_v18 }
 0x194   : > { %2123 = vmatprep.mubr.msk.f32.mxu1 %vm2592_vm1, %v2591_v1 }
 0x195   : > { %v851_v23 = vpop.permute.xlu1 %850 }
 0x196   : > { %v861_v24 = vsel %vm858_vm7, %v857_v22, %v851_v23 }
 0x197   : > { %2124 = vmatmul.mubr.msk.f32.gmra.mrb[10].mxu1 %vm862_vm8, %v861_v24 }
 0x198   : > { %2192 = vmatprep.mubr.msk.f32.mxu1 %vm2592_vm1, %v2591_v1 }
 0x261   : > { %v955_v29 = vpop.f32.mrb[6].mxu1 }
 0x262   : > { %v956_v30 = vadd.f32 %v1903_v28, %v955_v29  ;;  %v2119_v31 = vpop.f32.mrb[7].mxu1  ;;  %v1935_v29 = vld [vmem:[%s3343_s8 + $0x38] sm:$0xff] }
 0x264   : > { %v969_v32 = vmax.f32 %v956_v30, 0.0 }
 0x266   : > { %v960_v33 = vpop.f32.mrb[8].mxu1  ;;  %2135 = vmatmul.mubr.msk.f32.vlgmr.msra.gmra.mrb[0].mxu0 %vm577_vm2, %v969_v32 }
 0x267   : > { %v961_v34 = vadd.f32 %v1903_v28, %v960_v33  ;;  %v2122_v35 = vpop.f32.mrb[9].mxu1  ;;  %2137 = vmatprep.mubr.msk.f32.mxu0 %vm2592_vm1, %v2591_v1  ;;  %2302 = vmatpush3.bf16.msra.mxu0 %v2301_v44 }
 0x268   : > { %2303 = vmatprep.subr.bf16.mxu0 %v2593_v20 }
 0x269   : > { %v970_v36 = vmax.f32 %v961_v34, 0.0 }
 0x26a   : > { %v965_v37 = vpop.f32.mrb[10].mxu1 }
 0x26b   : > { %v966_v38 = vadd.f32 %v1903_v28, %v965_v37  ;;  %v2125_v39 = vpop.f32.mrb[11].mxu1  ;;  %2138 = vmatmul.mubr.msk.f32.gmra.mrb[2].mxu0 %vm577_vm2, %v970_v36 }
 0x26c   : > { %2140 = vmatprep.mubr.msk.f32.mxu0 %vm2592_vm1, %v2591_v1  ;;  %2305 = vmatpush3.bf16.msra.mxu0 %v2304_v46 }
 0x26d   : > { %v971_v40 = vmax.f32 %v966_v38, 0.0  ;;  %2306 = vmatprep.subr.bf16.mxu0 %v2593_v20 }
 0x26f   : > { %2141 = vmatmul.mubr.msk.f32.gmra.mrb[4].mxu0 %vm577_vm2, %v971_v40 }
 0x270   : > { %2175 = vmatprep.mubr.msk.f32.mxu0 %vm2592_vm1, %v2591_v1  ;;  %2308 = vmatpush3.bf16.msra.mxu0 %v2307_v49 }
 0x271   : > { %2309 = vmatprep.subr.bf16.mxu0 %v2593_v20 }
 0x274   : > { %2311 = vmatpush3.bf16.msra.mxu0 %v2310_v52 }
 0x275   : > { %2312 = vmatprep.subr.bf16.mxu0 %v2593_v20 }
 0x278   : > { %2314 = vmatpush3.bf16.msra.mxu0 %v2313_v55 }
 0x279   : > { %2315 = vmatprep.subr.bf16.mxu0 %v2593_v20 }
 0x27c   : > { %2317 = vmatpush3.bf16.msra.mxu0 %v2316_v59 }
 0x27d   : > { %2318 = vmatprep.subr.bf16.mxu0 %v2593_v20 }
 0x280   : > { %2320 = vmatpush3.bf16.msra.mxu0 %v2319_v62 }
 0x281   : > { %2321 = vmatprep.subr.bf16.mxu0 %v2593_v20 }
 0x284   : > { %2323 = vmatpush3.bf16.msra.mxu0 %v2322_v13 }
 0x285   : > { %2330 = vmatprep.subr.bf16.mxu0 %v2593_v20 }
 0x339   : > { %v1058_v3 = vpop.f32.mrb[0].mxu0 }
 0x33a   : > { %v1059_v5 = vadd.f32 %v1907_v0, %v1058_v3  ;;  %v2136_v6 = vpop.f32.mrb[1].mxu0 }
 0x33b   : > { %v1942_v6 = vld [vmem:[%s3341_s6 + $0x108] sm:$0xff] }
 0x33c   : > { %v1072_v12 = vadd.f32 %v1059_v5, %v2887_v58  ;;  %v1941_v5 = vld [vmem:[%s3341_s6 + $0x100] sm:$0xff] }
 0x33d   : > { %v2331_v11 = vpack.c.bf16 %v1942_v6, %v1941_v5 }
 0x33e   : > { %v1063_v15 = vpop.f32.mrb[2].mxu0  ;;  %v1075_v17 = vmul.f32 %v2999_v8, %v1072_v12  ;;  %v1944_v12 = vld [vmem:[%s3341_s6 + $0x118] sm:$0xff] }
 0x33f   : > { %v1064_v18 = vadd.f32 %v1907_v0, %v1063_v15  ;;  %v2139_v19 = vpop.f32.mrb[3].mxu0  ;;  %v2334_v13 = vpack.c.bf16 %v1944_v12, %v1943_v9  ;;  %v1945_v15 = vld [vmem:[%s3341_s6 + $0x120] sm:$0xff] }
 0x340   : > { %1078 = vst.msk [vmem:[#allocation2 + $0x8] sm:$0xff] %vm577_vm2, %v1075_v17  ;;  %v1946_v17 = vld [vmem:[%s3341_s6 + $0x128] sm:$0xff]  ;;  %v1947_v19 = vld [vmem:[%s3341_s6 + $0x130] sm:$0xff] }
 0x341   : > { %v1073_v21 = vadd.f32 %v1064_v18, %v2898_v63  ;;  %v1932_v63 = vld [vmem:[%s3343_s8 + $0x20] sm:$0xff]  ;;  %v2337_v18 = vpack.c.bf16 %v1946_v17, %v1945_v15 }
 0x342   : > { %v1068_v22 = vpop.f32.mrb[4].mxu0  ;;  %v2325_v28 = vpack.c.bf16 %v1933_v16, %v1932_v63  ;;  %v1953_v16 = vld [vmem:[%s3341_s6 + $0x160] sm:$0xff] }
 0x343   : > { %v1076_v58 = vmul.f32 %v3012_v10, %v1073_v21  ;;  %v1069_v23 = vadd.f32 %v1907_v0, %v1068_v22  ;;  %v2142_v24 = vpop.f32.mrb[5].mxu0  ;;  %v1948_v21 = vld [vmem:[%s3341_s6 + $0x138] sm:$0xff] }
 0x344   : > { %2326 = vmatpush3.bf16.msra.mxu1 %v2325_v28  ;;  %v2340_v22 = vpack.c.bf16 %v1948_v21, %v1947_v19 }
 0x345   : > { %1079 = vst.msk [vmem:[#allocation2 + $0x10] sm:$0xff] %vm577_vm2, %v1076_v58  ;;  %v1074_v14 = vadd.f32 %v1069_v23, %v2904_v2  ;;  %v1934_v2 = vld [vmem:[%s3343_s8 + $0x30] sm:$0xff]  ;;  %2327 = vmatprep.subr.bf16.mxu1 %v2593_v20  ;;  %v1949_v58 = vld [vmem:[%s3341_s6 + $0x140] sm:$0xff]  ;;  %v1950_v23 = vld [vmem:[%s3341_s6 + $0x148] sm:$0xff] }
 0x346   : > { %v2328_v32 = vpack.c.bf16 %v1935_v29, %v1934_v2  ;;  %v2343_v24 = vpack.c.bf16 %v1950_v23, %v1949_v58  ;;  %v1954_v2 = vld [vmem:[%s3341_s6 + $0x168] sm:$0xff]  ;;  %v1937_v29 = vld [vmem:[%s3344_s9 + $0x1] ss:$0 sm:$0xff] }
 0x347   : > { %v1077_v26 = vmul.f32 %v3021_v25, %v1074_v14  ;;  %v3026_v27 = vld [vmem:[#allocation2 + $0x8] sm:$0xff]  ;;  %v1951_v14 = vld [vmem:[%s3341_s6 + $0x150] sm:$0xff]  ;;  %v2349_v28 = vpack.c.bf16 %v1954_v2, %v1953_v16 }
 0x348   : > { %1093 = vrot.lane.b32.xlu0 %v3026_v27, %s2594_s26  ;;  %2329 = vmatpush3.bf16.msra.mxu1 %v2328_v32  ;;  %v1081_v37 = vld [vmem:[#allocation2 + $0x6] sm:$0xff] }
 0x349   : > { %1080 = vst.msk [vmem:[#allocation2 + $0x18] sm:$0xff] %vm577_vm2, %v1077_v26  ;;  %2354 = vmatprep.subr.bf16.mxu1 %v2593_v20  ;;  %v1952_v26 = vld [vmem:[%s3341_s6 + $0x158] sm:$0xff] }
 0x34a   : > { %v2346_v63 = vpack.c.bf16 %v1952_v26, %v1951_v14 }
 0x34c   : > { %v1087_v30 = vld [vmem:[#allocation2 + $0xa] sm:$0xff] }
 0x34d   : > { %v3043_v31 = vld [vmem:[#allocation2 + $0x10] sm:$0xff]  ;;  %1105 = vrot.lane.b32.xlu1 %v1087_v30, %s2595_s17 }
 0x34e   : > { %1095 = vrot.lane.b32.xlu0 %v3043_v31, %s2594_s26  ;;  %v1082_v42 = vld [vmem:[#allocation2 + $0xe] sm:$0xff] }
 0x350   : > { %v1088_v33 = vld [vmem:[#allocation2 + $0x12] sm:$0xff]  ;;  %v1089_v35 = vld [vmem:[#allocation2 + $0x1a] sm:$0xff] }
 0x351   : > { %v3049_v34 = vld [vmem:[#allocation2 + $0x18] sm:$0xff]  ;;  %1107 = vrot.lane.b32.xlu1 %v1088_v33, %s2595_s17 }
 0x352   : > { %1097 = vrot.lane.b32.xlu0 %v3049_v34, %s2594_s26  ;;  %v1083_v47 = vld [vmem:[#allocation2 + $0x16] sm:$0xff] }
 0x355   : > { %1109 = vrot.lane.b32.xlu1 %v1089_v35, %s2595_s17  ;;  %v1955_v35 = vld [vmem:[%s3341_s6 + $0x170] sm:$0xff] }
 0x3ba   : > { %v1094_v36 = vpop.permute.xlu0 %1093 }
 0x3bb   : > { %v1114_v38 = vsel %vm577_vm2, %v1081_v37, %v1094_v36  ;;  %v1956_v36 = vld [vmem:[%s3341_s6 + $0x178] sm:$0xff] }
 0x3bf   : > { %v1106_v39 = vpop.permute.xlu1 %1105 }
 0x3c0   : > { %v1096_v40 = vpop.permute.xlu0 %1095  ;;  %v1117_v41 = vsel %vm858_vm7, %v1114_v38, %v1106_v39  ;;  %v2352_v38 = vpack.c.bf16 %v1956_v36, %v1955_v35  ;;  %v1607_v35 = vld [vmem:[%s3345_s10 + $0x18] sm:$0xff] }
 0x3c1   : > { %2176 = vmatmul.mubr.msk.f32.vlgmr.msra.gmra.mrb[6].mxu0 %vm862_vm8, %v1117_v41  ;;  %v1115_v43 = vsel %vm577_vm2, %v1082_v42, %v1096_v40 }
 0x3c2   : > { %2178 = vmatprep.mubr.msk.f32.mxu0 %vm2592_vm1, %v2591_v1  ;;  %2332 = vmatpush3.bf16.msra.mxu0 %v2331_v11 }
 0x3c3   : > { %v1108_v44 = vpop.permute.xlu1 %1107  ;;  %2333 = vmatprep.subr.bf16.mxu0 %v2593_v20 }
 0x3c4   : > { %v1118_v45 = vsel %vm858_vm7, %v1115_v43, %v1108_v44  ;;  %v1098_v46 = vpop.permute.xlu0 %1097 }
 0x3c5   : > { %2179 = vmatmul.mubr.msk.f32.gmra.mrb[8].mxu0 %vm862_vm8, %v1118_v45  ;;  %v1116_v48 = vsel %vm577_vm2, %v1083_v47, %v1098_v46 }
 0x3c6   : > { %2181 = vmatprep.mubr.msk.f32.mxu0 %vm2592_vm1, %v2591_v1  ;;  %2335 = vmatpush3.bf16.msra.mxu0 %v2334_v13 }
 0x3c7   : > { %v1110_v49 = vpop.permute.xlu1 %1109  ;;  %2336 = vmatprep.subr.bf16.mxu0 %v2593_v20 }
 0x3c8   : > { %v1119_v50 = vsel %vm858_vm7, %v1116_v48, %v1110_v49 }
 0x3c9   : > { %2182 = vmatmul.mubr.msk.f32.gmra.mrb[10].mxu0 %vm862_vm8, %v1119_v50  ;;  %v1963_v50 = vld [vmem:[%s3343_s8 + $0x48] sm:$0xff] }
 0x3ca   : > { %2233 = vmatprep.mubr.msk.f32.mxu0 %vm2592_vm1, %v2591_v1  ;;  %2338 = vmatpush3.bf16.msra.mxu0 %v2337_v18  ;;  %v1958_v18 = vld [vmem:[%s3342_s7 + $0x2] ss:$0 sm:$0xff] }
 0x3cb   : > { %2339 = vmatprep.subr.bf16.mxu0 %v2593_v20 }
 0x3ce   : > { %2341 = vmatpush3.bf16.msra.mxu0 %v2340_v22 }
 0x3cf   : > { %2342 = vmatprep.subr.bf16.mxu0 %v2593_v20 }
 0x3d2   : > { %2344 = vmatpush3.bf16.msra.mxu0 %v2343_v24 }
 0x3d3   : > { %2345 = vmatprep.subr.bf16.mxu0 %v2593_v20 }
 0x3d6   : > { %2347 = vmatpush3.bf16.msra.mxu0 %v2346_v63 }
 0x3d7   : > { %2348 = vmatprep.subr.bf16.mxu0 %v2593_v20 }
 0x3da   : > { %2350 = vmatpush3.bf16.msra.mxu0 %v2349_v28 }
 0x3db   : > { %2351 = vmatprep.subr.bf16.mxu0 %v2593_v20 }
 0x3de   : > { %2353 = vmatpush3.bf16.msra.mxu0 %v2352_v38 }
 0x494   : > { %v1214_v52 = vpop.f32.mrb[6].mxu0 }
 0x495   : > { %v1215_v53 = vadd.f32 %v1928_v51, %v1214_v52  ;;  %v2177_v54 = vpop.f32.mrb[7].mxu0  ;;  %v1965_v52 = vld [vmem:[%s3343_s8 + $0x58] sm:$0xff] }
 0x497   : > { %v1228_v55 = vmax.f32 %v1215_v53, 0.0 }
 0x498   : > { %v1219_v56 = vpop.f32.mrb[8].mxu0 }
 0x499   : > { %v1220_v57 = vadd.f32 %v1928_v51, %v1219_v56  ;;  %v2180_v59 = vpop.f32.mrb[9].mxu0  ;;  %2193 = vmatmul.mubr.msk.f32.vlgmr.msra.gmra.mrb[12].mxu1 %vm577_vm2, %v1228_v55 }
 0x49a   : > { %2195 = vmatprep.mubr.msk.f32.mxu1 %vm2592_vm1, %v2591_v1 }
 0x49b   : > { %v1229_v60 = vmax.f32 %v1220_v57, 0.0 }
 0x49c   : > { %v1224_v61 = vpop.f32.mrb[10].mxu0 }
 0x49d   : > { %v1225_v62 = vadd.f32 %v1928_v51, %v1224_v61  ;;  %v2183_v0 = vpop.f32.mrb[11].mxu0  ;;  %2196 = vmatmul.mubr.msk.f32.gmra.mrb[14].mxu1 %vm577_vm2, %v1229_v60 }
 0x49e   : > { %2198 = vmatprep.mubr.msk.f32.mxu1 %vm2592_vm1, %v2591_v1 }
 0x49f   : > { %v1230_v3 = vmax.f32 %v1225_v62, 0.0 }
 0x4a1   : > { %2199 = vmatmul.mubr.msk.f32.gmra.mrb[16].mxu1 %vm577_vm2, %v1230_v3 }
 0x4a2   : > { %2250 = vmatprep.mubr.msk.f32.mxu1 %vm2592_vm1, %v2591_v1 }
 0x56c   : > { %v1319_v30 = vpop.f32.mrb[12].mxu1 }
 0x56d   : > { %v1320_v32 = vadd.f32 %v1937_v29, %v1319_v30  ;;  %v2194_v33 = vpop.f32.mrb[13].mxu1  ;;  %v1605_v30 = vld [vmem:[%s3345_s10 + $0x8] sm:$0xff] }
 0x56e   : > { %v1606_v33 = vld [vmem:[%s3345_s10 + $0x10] sm:$0xff] }
 0x56f   : > { %v1333_v37 = vadd.f32 %v1320_v32, %v3026_v27  ;;  %v2364_v36 = vpack.c.bf16 %v1607_v35, %v1606_v33 }
 0x570   : > { %v1324_v39 = vpop.f32.mrb[14].mxu1 }
 0x571   : > { %v1336_v40 = vmul.f32 %v2999_v8, %v1333_v37  ;;  %v1325_v41 = vadd.f32 %v1937_v29, %v1324_v39  ;;  %v2197_v42 = vpop.f32.mrb[15].mxu1  ;;  %v1967_v37 = vld [vmem:[%s3344_s9 + $0x2] ss:$0 sm:$0xff] }
 0x573   : > { %1339 = vst.msk [vmem:[#allocation2 + $0x8] sm:$0xff] %vm577_vm2, %v1336_v40  ;;  %v1334_v43 = vadd.f32 %v1325_v41, %v3043_v31  ;;  %v1962_v31 = vld [vmem:[%s3343_s8 + $0x40] sm:$0xff] }
 0x574   : > { %v1329_v44 = vpop.f32.mrb[16].mxu1  ;;  %v2355_v51 = vpack.c.bf16 %v1963_v50, %v1962_v31 }
 0x575   : > { %v1337_v45 = vmul.f32 %v3012_v10, %v1334_v43  ;;  %v1330_v46 = vadd.f32 %v1937_v29, %v1329_v44  ;;  %v2200_v47 = vpop.f32.mrb[17].mxu1  ;;  %v1604_v29 = vld [vmem:[%s3345_s10] sm:$0xff] }
 0x576   : > { %2356 = vmatpush3.bf16.msra.mxu1 %v2355_v51  ;;  %v2361_v32 = vpack.c.bf16 %v1605_v30, %v1604_v29 }
 0x577   : > { %1340 = vst.msk [vmem:[#allocation2 + $0x10] sm:$0xff] %vm577_vm2, %v1337_v45  ;;  %v1335_v27 = vadd.f32 %v1330_v46, %v3049_v34  ;;  %v1964_v34 = vld [vmem:[%s3343_s8 + $0x50] sm:$0xff]  ;;  %2357 = vmatprep.subr.bf16.mxu1 %v2593_v20 }
 0x578   : > { %v2358_v55 = vpack.c.bf16 %v1965_v52, %v1964_v34 }
 0x579   : > { %v1338_v48 = vmul.f32 %v3021_v25, %v1335_v27 }
 0x57a   : > { %v3149_v49 = vld [vmem:[#allocation2 + $0x8] sm:$0xff]  ;;  %2359 = vmatpush3.bf16.msra.mxu1 %v2358_v55 }
 0x57b   : > { %1341 = vst.msk [vmem:[#allocation2 + $0x18] sm:$0xff] %vm577_vm2, %v1338_v48  ;;  %1352 = vrot.lane.b32.xlu0 %v3149_v49, %s2594_s26  ;;  %2360 = vmatprep.subr.bf16.mxu1 %v2593_v20  ;;  %v1342_v61 = vld [vmem:[#allocation2 + $0x4] sm:$0xff] }
 0x57e   : > { %v3166_v53 = vld [vmem:[#allocation2 + $0x10] sm:$0xff] }
 0x57f   : > { %v1343_v54 = vld [vmem:[#allocation2 + $0xc] sm:$0xff]  ;;  %1354 = vrot.lane.b32.xlu0 %v3166_v53, %s2594_s26 }
 0x580   : > { %1364 = vrot.lane.b32.xlu1 %v1343_v54, %s2595_s17 }
 0x582   : > { %v3172_v56 = vld [vmem:[#allocation2 + $0x18] sm:$0xff] }
 0x583   : > { %v1344_v57 = vld [vmem:[#allocation2 + $0x14] sm:$0xff]  ;;  %1356 = vrot.lane.b32.xlu0 %v3172_v56, %s2594_s26  ;;  %v1348_v59 = vld [vmem:[#allocation2 + $0x1c] sm:$0xff]  ;;  %s1975_s26 = sshll.u32 %s2576_s16, 1  ;;  %s2596_s16 = smov [#allocation5]  }
 0x584   : > { %1366 = vrot.lane.b32.xlu1 %v1344_v57, %s2595_s17  ;;  %s2464_s19 = sshll.u32 %s2596_s16, 4  ;;  %s2465_s19 = int_to_ptr.vmem [resolvable:$false] %s2464_s19 }
 0x585   : > { %s2466_s20 = scalar_lea.vmem %s2465_s19, 256  ;;  %p2467_p11 = scmp.lt.s32.totalorder %s3242_s4, %s2465_s19 }
 0x586   : > { %p2468_p12 = scmp.lt.s32.totalorder %s2466_s20, %s2460_s14 }
 0x588   : > { %1368 = vrot.lane.b32.xlu1 %v1348_v59, %s2595_s17  ;;  %s3239_s17 = sadd.s32 %s2572_s15, %s1975_s26  ;;  %p2469_p0 = por %p2468_p12, %p2467_p11 }
 0x589   : > { %s3358_s23 = sshll.u32 %s3239_s17, 7 }
 0x58a   : > { %s1709_s1 = scalar_lea.hbm %s3347_s12, %s3358_s23  ;;  %p2470_p1 = pnand %p2469_p0, %p2463_p10 }
 0x5ed   : > { %v1353_v60 = vpop.permute.xlu0 %1352 }
 0x5ee   : > { %v1373_v62 = vsel %vm577_vm2, %v1342_v61, %v1353_v60 }
 0x5f1   : > { %v1355_v0 = vpop.permute.xlu0 %1354 }
 0x5f2   : > { %v1365_v3 = vpop.permute.xlu1 %1364  ;;  %v1374_v6 = vsel %vm577_vm2, %v1343_v54, %v1355_v0 }
 0x5f3   : > { %v1376_v5 = vsel %vm858_vm7, %v1373_v62, %v1365_v3 }
 0x5f4   : > { %2234 = vmatmul.mubr.msk.f32.vlgmr.msra.gmra.mrb[12].mxu0 %vm862_vm8, %v1376_v5 }
 0x5f5   : > { %2236 = vmatprep.mubr.msk.f32.mxu0 %vm2592_vm1, %v2591_v1  ;;  %v1357_v11 = vpop.permute.xlu0 %1356 }
 0x5f6   : > { %v1367_v9 = vpop.permute.xlu1 %1366  ;;  %v1375_v13 = vsel %vm577_vm2, %v1344_v57, %v1357_v11 }
 0x5f7   : > { %v1377_v12 = vsel %vm858_vm7, %v1374_v6, %v1367_v9 }
 0x5f8   : > { %2237 = vmatmul.mubr.msk.f32.gmra.mrb[14].mxu0 %vm862_vm8, %v1377_v12 }
 0x5f9   : > { %2239 = vmatprep.mubr.msk.f32.mxu0 %vm2592_vm1, %v2591_v1 }
 0x5fa   : > { %v1369_v15 = vpop.permute.xlu1 %1368 }
 0x5fb   : > { %v1378_v17 = vsel %vm858_vm7, %v1375_v13, %v1369_v15 }
 0x5fc   : > { %2240 = vmatmul.mubr.msk.f32.gmra.mrb[16].mxu0 %vm862_vm8, %v1378_v17 }
 0x6c7   : > { %v1473_v19 = vpop.f32.mrb[12].mxu0 }
 0x6c8   : > { %v1474_v21 = vadd.f32 %v1958_v18, %v1473_v19  ;;  %v2235_v22 = vpop.f32.mrb[13].mxu0 }
 0x6ca   : > { %v1487_v58 = vmax.f32 %v1474_v21, 0.0 }
 0x6cb   : > { %v1478_v23 = vpop.f32.mrb[14].mxu0 }
 0x6cc   : > { %v1479_v24 = vadd.f32 %v1958_v18, %v1478_v23  ;;  %v2238_v14 = vpop.f32.mrb[15].mxu0  ;;  %2251 = vmatmul.mubr.msk.f32.vlgmr.msra.gmra.mrb[18].mxu1 %vm577_vm2, %v1487_v58 }
 0x6cd   : > { %2253 = vmatprep.mubr.msk.f32.mxu1 %vm2592_vm1, %v2591_v1  ;;  %2362 = vmatpush3.bf16.msra.mxu1 %v2361_v32 }
 0x6ce   : > { %v1488_v26 = vmax.f32 %v1479_v24, 0.0  ;;  %2363 = vmatprep.subr.bf16.mxu1 %v2593_v20 }
 0x6cf   : > { %v1483_v63 = vpop.f32.mrb[16].mxu0 }
 0x6d0   : > { %v1484_v16 = vadd.f32 %v1958_v18, %v1483_v63  ;;  %v2241_v2 = vpop.f32.mrb[17].mxu0  ;;  %2254 = vmatmul.mubr.msk.f32.gmra.mrb[20].mxu1 %vm577_vm2, %v1488_v26 }
 0x6d1   : > { %2256 = vmatprep.mubr.msk.f32.mxu1 %vm2592_vm1, %v2591_v1  ;;  %2365 = vmatpush3.bf16.msra.mxu1 %v2364_v36 }
 0x6d2   : > { %v1489_v28 = vmax.f32 %v1484_v16, 0.0 }
 0x6d4   : > { %2257 = vmatmul.mubr.msk.f32.gmra.mrb[22].mxu1 %vm577_vm2, %v1489_v28 }
 0x6d5   : > { %2267 = vmatprep.mubr.msk.f32.mxu1 %vm2592_vm1, %v2591_v1 }
 0x79f   : > { %v1578_v38 = vpop.f32.mrb[18].mxu1 }
 0x7a0   : > { %v1579_v39 = vadd.f32 %v1967_v37, %v1578_v38  ;;  %v2252_v40 = vpop.f32.mrb[19].mxu1 }
 0x7a2   : > { %v1592_v20 = vadd.f32 %v1579_v39, %v3149_v49 }
 0x7a3   : > { %v1583_v41 = vpop.f32.mrb[20].mxu1 }
 0x7a4   : > { %v1595_v42 = vmul.f32 %v2999_v8, %v1592_v20  ;;  %v1584_v43 = vadd.f32 %v1967_v37, %v1583_v41  ;;  %v2255_v44 = vpop.f32.mrb[21].mxu1 }
 0x7a6   : > { %1598 = vst.msk [vmem:[#allocation2 + $0x8] sm:$0xff] %vm577_vm2, %v1595_v42  ;;  %v1593_v45 = vadd.f32 %v1584_v43, %v3166_v53 }
 0x7a7   : > { %v1588_v46 = vpop.f32.mrb[22].mxu1 }
 0x7a8   : > { %v1596_v47 = vmul.f32 %v3012_v10, %v1593_v45  ;;  %v1589_v27 = vadd.f32 %v1967_v37, %v1588_v46  ;;  %v2258_v48 = vpop.f32.mrb[23].mxu1 }
 0x7aa   : > { %1599 = vst.msk [vmem:[#allocation2 + $0x10] sm:$0xff] %vm577_vm2, %v1596_v47  ;;  %v1594_v49 = vadd.f32 %v1589_v27, %v3172_v56 }
 0x7ac   : > { %v1597_v8 = vmul.f32 %v3021_v25, %v1594_v49 }
 0x7ae   : > { %1600 = vst.msk [vmem:[#allocation2 + $0x18] sm:$0xff] %vm577_vm2, %v1597_v8 }
 0x7b1   : > { %v1601_v31 = vld [vmem:[#allocation2 + $0x10] sm:$0xff] }
 0x7b2   : > { %2268 = vmatmul.mubr.msk.f32.vlgmr.msra.gmra.mrb[24].mxu1 %vm577_vm2, %v1601_v31  ;;  %v1602_v10 = vsel %vm577_vm2, %v1601_v31, 0.0 }
 0x7b3   : > { %1603 = vst [vmem:[%s497_s27] sm:$0xff] %v1602_v10 }
 0x7b4   : > { %2473 = shalt.err (!%p2470_p1)
}
 0x7b5   : > { %s2474_s21 = scalar_lea.hbm %s1709_s1, 128  ;;  %s2478_s18 = scalar_lea.hbm %s3347_s12, 512 }
 0x7b6   : > { %p2475_p2 = scmp.ne.s32.totalorder %s1709_s1, %s2474_s21  ;;  %p2479_p5 = scmp.lt.u32.totalorder %s1709_s1, %s3347_s12 }
 0x7b7   : > { %p2480_p6 = scmp.lt.u32.totalorder %s2478_s18, %s2474_s21  ;;  %p2482_p9 = scmp.lt.u32.totalorder %s2474_s21, %s1709_s1 }
 0x7b8   : > { %p2476_p3 = pnand %p2475_p2, %p2722_p8 }
 0x7b9   : > { %p2481_p7 = por %p2480_p6, %p2479_p5 }
 0x7ba   : > { %p2477_p4 = pneg %p2476_p3 }
 0x7bb   : > { %p2483_p11 = por %p2482_p9, %p2481_p7 }
 0x7bd   : > { %p2484_p10 = pnand %p2483_p11, %p2477_p4 }
 0x7bf   : > { %2487 = shalt.err (!%p2484_p10)
}
 0x7c0   : > { %2366 = dma.vmem_to_hbm [thread:$0]  (%p2722_p8), %s3242_s4, 128, %s1709_s1, %s1691_s30   ;;  %v572_v25 = vstv %s1887_s22  ;;  %v1971_v34 = vld [vmem:[%s3346_s11] ss:$0 sm:$0xff] }
 0x7c1   : > { %v573_v50 = vadd.s32 %v572_v25, %v2770_v4  ;;  %s504_s16 = scalar_lea.vmem [#allocation7], %s1879_s28  ;;  %s3380_s15 = sshll.u32 %s3239_s17, 7 }
 0x7c2   : > { %s1726_s19 = sshll.u32 %s504_s16, 4  ;;  %s3281_s1 = scalar_lea.hbm %s3348_s13, %s3380_s15  ;;  %s3283_s19 = int_to_ptr.vmem [resolvable:$true] %s1726_s19 }
 0x7c3   : > { %vm574_vm1 = vcmp.lt.s32.totalorder %v573_v50, %v2781_v7  ;;  %s1696_s30 = scalar_lea.sflag [#allocation8], %s3228_s24  ;;  %s2488_s20 = scalar_lea.vmem %s3283_s19, 128 }
 0x7c4   : > { %v1895_v51 = vsel %vm574_vm1, 1.0, %v2591_v1  ;;  %p2489_p12 = scmp.ne.s32.totalorder %s3283_s19, %s2488_s20  ;;  %s2597_s28 = smov [#allocation7]  }
 0x7c5   : > { %s2492_s21 = sshll.u32 %s2597_s28, 4  ;;  %s2493_s21 = int_to_ptr.vmem [resolvable:$false] %s2492_s21 }
 0x7c6   : > { %p2490_p0 = pnand %p2489_p12, %p2722_p8  ;;  %s2494_s17 = scalar_lea.vmem %s2493_s21, 256 }
 0x7c7   : > { %p2495_p2 = scmp.lt.s32.totalorder %s3283_s19, %s2493_s21  ;;  %p2496_p3 = scmp.lt.s32.totalorder %s2494_s17, %s2488_s20 }
 0x7c8   : > { %p2491_p1 = pneg %p2490_p0 }
 0x7c9   : > { %p2497_p4 = por %p2496_p3, %p2495_p2 }
 0x7cb   : > { %p2498_p5 = pnand %p2497_p4, %p2491_p1 }
 0x885   : > { %v1684_v52 = vpop.f32.mrb[24].mxu1 }
 0x886   : > { %v1685_v53 = vadd.f32 %v1971_v34, %v1684_v52  ;;  %v2269_v54 = vpop.f32.mrb[25].mxu1 }
 0x888   : > { %v1688_v55 = vmul.f32 %v1895_v51, %v1685_v53 }
 0x88a   : > { %1689 = vst [vmem:[%s504_s16] sm:$0xff] %v1688_v55 }
 0x88b   : > { %2501 = shalt.err (!%p2498_p5)
}
 0x88c   : > { %s2502_s24 = scalar_lea.hbm %s3281_s1, 128  ;;  %s2506_s18 = scalar_lea.hbm %s3348_s13, 512 }
 0x88d   : > { %p2503_p6 = scmp.ne.s32.totalorder %s3281_s1, %s2502_s24  ;;  %p2507_p11 = scmp.lt.u32.totalorder %s3281_s1, %s3348_s13 }
 0x88e   : > { %p2508_p10 = scmp.lt.u32.totalorder %s2506_s18, %s2502_s24  ;;  %p2510_p0 = scmp.lt.u32.totalorder %s2502_s24, %s3281_s1 }
 0x88f   : > { %p2504_p7 = pnand %p2503_p6, %p2722_p8 }
 0x890   : > { %p2509_p12 = por %p2508_p10, %p2507_p11 }
 0x891   : > { %p2505_p9 = pneg %p2504_p7 }
 0x892   : > { %p2511_p1 = por %p2510_p0, %p2509_p12 }
 0x894   : > { %p2512_p2 = pnand %p2511_p1, %p2505_p9 }
 0x896   : > { %2515 = shalt.err (!%p2512_p2)
}
 0x897   : > { %2367 = dma.vmem_to_hbm [thread:$0]  (%p2722_p8), %s3283_s19, 128, %s3281_s1, %s1696_s30  }
 0x898 PF: > { %s3381_s14 = sld [smem:[#allocation16_spill]]  ;;  %s3382_s16 = sld [smem:[#allocation12_spill]] }
 0x89e   : > { %p2377_p3 = scmp.ge.s32.totalorder %s3381_s14, 2  ;;  %s1738_s22 = sand.u32 1, %s3382_s16  }
 0x89f   : > { %s1739_s4 = scalar_lea.sflag [#allocation6], %s1738_s22 }
 0x8a0   : > { %p2371_p4 = pnand %p2377_p3, %p2731_p13 }
 0x8a2   : > { %2551 = dma.done.wait (!%p2371_p4), %s1739_s4, 128  }
 0x8a3   : > { %2553 = vsyncadd (!%p2371_p4), %s1739_s4, 4294967168  ;;  %s1748_s20 = scalar_lea.sflag [#allocation8], %s1738_s22 }
 0x8a4   : > { %2555 = dma.done.wait (!%p2371_p4), %s1748_s20, 128  }
 0x8a5   : > { %2557 = vsyncadd (!%p2371_p4), %s1748_s20, 4294967168  ;;  %s36_s19 = sadd.s32 1, %s3381_s14   ;;  %s3384_s25 = sld [smem:[#allocation13_spill]] }
 0x8a6   : > { %p33_p5 = scmp.ge.s32.totalorder %s36_s19, 6   ;;  %s3385_s14 = sld [smem:[#allocation20_spill]] }
 0x8a7   : > { %s3386_s15 = sld [smem:[#allocation14_spill]]  ;;  %s3387_s16 = sld [smem:[#allocation15_spill]] }
 0x8a8   : > { %s3388_s17 = sld [smem:[#allocation17_spill]]  ;;  %s3389_s18 = sld [smem:[#allocation18_spill]] }
 0x8a9   : > { %s3390_s30 = smov %s2564_s0  ;;  %35 = sbr.rel (!%p33_p5) target bundleno = 23 (0x17), region = 130 }
 0x8ab   : > { %s3391_s0 = smov %s3384_s25 }
 0x8b0   :  { %1753 = vsyncpa [#allocation6], 1 }
 0x8b1   :  { %1755 = vsyncpa [#allocation6 + $0x1], 1 }
 0x8b2   :  { %1756 = vsyncpa [#allocation8], 1 }
 0x8b3   :  { %1758 = vsyncpa [#allocation8 + $0x1], 1 }

</bundles_post_ra>
